<compile_context>
chip_gen: v7x
topology: tpu7x:2x2x1
jax: 0.10.0
libtpu: 0.0.40
codegen_flags: <defaults>
</compile_context>

<pallas_src>
import jax
import jax.numpy as jnp
import numpy as np
from jax.experimental import pallas as pl
from jax.experimental.pallas import tpu as pltpu

NUM_FEATURES = 71
DIM = 64
SEQ = 8          # Linear(2*dim, 10) after two stride-2 k=4 convs forces L_in = 8
BATCH = 2

_C1 = 2 * DIM    # 128
_C2 = 3 * DIM    # 192
_K = 4
_W_COLS = 256    # lane width of both slabs (>= 192, multiple of 128)

# ----- static weight-slab row offsets (match pack_params ordering) -----
_OFF_C1W = 0
_OFF_RB1_C1W = _OFF_C1W + _C1                  # 128
_OFF_RB1_COMB = _OFF_RB1_C1W + _C1             # 256
_OFF_RB4_C1W = _OFF_RB1_COMB + 2 * _K * _C1    # 1280
_OFF_RB4_COMB = _OFF_RB4_C1W + _C2             # 1472
_OFF_LINW = _OFF_RB4_COMB + 2 * _K * _C2       # 3008
_W_ROWS = _OFF_LINW + _C1                      # 3136

# ----- static vector-slab row indices -----
_V_C1B = 0
_V_RB1 = 1     # rows 1..6 : bn1_s, bn1_b, c1x1_b, bn2_s, bn2_b, combined bias
_V_RB4 = 7     # rows 7..12
_V_LINB = 13
_V_ROWS = 16


# =============================== kernel ====================================

def _text_classifier_kernel(x_ref, w_ref, v_ref, o_ref):
    V = v_ref[...]                                    # (16, 256) f32, one load

    def vec(row, width):                              # (1, width) f32
        return V[row:row + 1, :width]

    def wblk(off, rows, cols):                        # static VMEM window, bf16
        return w_ref[off:off + rows, :cols]

    def mm(a, w, b):                                  # bf16 MXU, f32 accumulate
        return jnp.dot(a.astype(jnp.bfloat16), w,
                       preferred_element_type=jnp.float32) + b

    def im2col(h, L, C, l_out, stride, pad):
        # h: (B*L, C) f32, row = b*L + l  ->  (B*l_out, K*C), row = b*l_out + t
        zero = jnp.zeros((1, C), h.dtype)
        rows = []
        for b in range(BATCH):
            for t in range(l_out):
                taps = []
                for j in range(_K):
                    l = stride * t + j - pad
                    if 0 <= l < L:
                        taps.append(h[b * L + l:b * L + l + 1, :])
                    else:
                        taps.append(zero)             # zero-padding tap
                rows.append(jnp.concatenate(taps, axis=1))
        return jnp.concatenate(rows, axis=0)

    def resblock(h, L, cin, cout, l_out, stride, pad, off_c1, off_comb, vrow):
        out = jnp.maximum(h * vec(vrow + 0, cin) + vec(vrow + 1, cin), 0.0)
        out = mm(out, wblk(off_c1, cin, cin), vec(vrow + 2, cin))      # 1x1 conv
        out = jnp.maximum(out * vec(vrow + 3, cin) + vec(vrow + 4, cin), 0.0)
        # conv2 (0.3 folded) + downsample (BN folded) fused into one matmul
        patch = jnp.concatenate(
            [im2col(out, L, cin, l_out, stride, pad),
             im2col(h, L, cin, l_out, stride, pad)], axis=1)
        return mm(patch, wblk(off_comb, 2 * _K * cin, cout), vec(vrow + 5, cout))

    x = x_ref[...]                                                    # (16, 128)
    h = mm(x, wblk(_OFF_C1W, _C1, _C1), vec(_V_C1B, _C1))             # conv1
    h = resblock(h, 8, _C1, _C2, 4, 2, 1, _OFF_RB1_C1W, _OFF_RB1_COMB, _V_RB1)
    h = resblock(h, 4, _C2, _C1, 1, 2, 0, _OFF_RB4_C1W, _OFF_RB4_COMB, _V_RB4)
    # TODO(synk): `self.d = nn.d(p=0.5)` in the PyTorch source is a (typo'd)
    # Dropout; eval-mode dropout is the identity, so nothing is applied here.
    logits = mm(h, wblk(_OFF_LINW, _C1, _C1), vec(_V_LINB, _C1))      # (B, 128)
    o_ref[...] = jax.nn.sigmoid(logits).astype(o_ref.dtype)


def text_classifier_forward(x, wslab, vslab):
    B, L, F = x.shape
    # lane-dense, flattened input: (B*L, 128) with zero-padded features
    xp = jnp.zeros((B * L, _C1), jnp.float32)
    xp = xp.at[:, :F].set(x.reshape(B * L, F).astype(jnp.float32))
    vmem = pl.BlockSpec(memory_space=pltpu.MemorySpace.VMEM)
    out = pl.pallas_call(
        _text_classifier_kernel,
        out_shape=jax.ShapeDtypeStruct((B, _C1), jnp.float32),
        in_specs=[vmem, vmem, vmem],
        out_specs=vmem,
    )(xp, wslab, vslab)
    return out[:, :10]            # drop lane padding of the logits


# ======================= host-side params & packing ========================

def _bn_params(key, c):
    k1, k2, k3, k4 = jax.random.split(key, 4)
    return dict(gamma=1.0 + 0.1 * jax.random.normal(k1, (c,), jnp.float32),
                beta=0.1 * jax.random.normal(k2, (c,), jnp.float32),
                mean=0.1 * jax.random.normal(k3, (c,), jnp.float32),
                var=0.5 + jax.random.uniform(k4, (c,), jnp.float32))


def init_raw_params(key):
    ks = iter(jax.random.split(key, 40))

    def nrm(shape, scale):
        return scale * jax.random.normal(next(ks), shape, jnp.float32)

    def rb(cin, cout, k):
        return dict(bn1=_bn_params(next(ks), cin),
                    c1w=nrm((cin, cin), 1.0 / np.sqrt(cin)),
                    c1b=nrm((cin,), 0.05),
                    bn2=_bn_params(next(ks), cin),
                    c2w=nrm((k, cin, cout), 1.0 / np.sqrt(k * cin)),
                    c2b=nrm((cout,), 0.05),
                    dw=nrm((k, cin, cout), 1.0 / np.sqrt(k * cin)),
                    db=nrm((cout,), 0.05),
                    dbn=_bn_params(next(ks), cout))

    raw = dict(c1w=nrm((NUM_FEATURES, _C1), 1.0 / np.sqrt(NUM_FEATURES)),
               c1b=nrm((_C1,), 0.05),
               rb1=rb(_C1, _C2, _K),
               rb4=rb(_C2, _C1, _K),
               lw=nrm((_C1, 10), 1.0 / np.sqrt(_C1)),
               lb=nrm((10,), 0.05))
    return raw


def pack_params(raw, eps=1e-5):
    def fold_bn(bn):
        s = bn["gamma"] / jnp.sqrt(bn["var"] + eps)
        return s, bn["beta"] - bn["mean"] * s

    def padw(a):
        return jnp.pad(a, ((0, 0), (0, _W_COLS - a.shape[1])))

    def padv(v):
        v = jnp.asarray(v, jnp.float32).reshape(1, -1)
        return jnp.pad(v, ((0, 0), (0, _W_COLS - v.shape[1])))

    wparts, vparts = [], []

    # conv1 (features zero-padded 71 -> 128)
    wparts.append(padw(jnp.pad(raw["c1w"], ((0, _C1 - NUM_FEATURES), (0, 0)))))
    vparts.append(padv(raw["c1b"]))

    def pack_rb(p, cin, cout):
        s1, t1 = fold_bn(p["bn1"])
        s2, t2 = fold_bn(p["bn2"])
        sd, td = fold_bn(p["dbn"])
        wparts.append(padw(p["c1w"]))                               # 1x1 conv
        w2 = 0.3 * p["c2w"].reshape(_K * cin, cout)                 # 0.3 folded
        wd = (p["dw"] * sd[None, None, :]).reshape(_K * cin, cout)  # BN folded
        wparts.append(padw(jnp.concatenate([w2, wd], axis=0)))
        bcomb = 0.3 * p["c2b"] + p["db"] * sd + td
        for v in (s1, t1, p["c1b"], s2, t2, bcomb):
            vparts.append(padv(v))

    pack_rb(raw["rb1"], _C1, _C2)
    pack_rb(raw["rb4"], _C2, _C1)

    wparts.append(padw(raw["lw"]))                                  # (128,10)->lane pad
    vparts.append(padv(raw["lb"]))

    wslab = jnp.concatenate(wparts, axis=0).astype(jnp.bfloat16)
    assert wslab.shape == (_W_ROWS, _W_COLS)
    vslab = jnp.concatenate(vparts, axis=0).astype(jnp.float32)
    vslab = jnp.pad(vslab, ((0, _V_ROWS - vslab.shape[0]), (0, 0)))
    return wslab, vslab


# ============================ pure-JAX reference ============================

def _bn_ref(x, p, eps=1e-5):
    return (x - p["mean"]) * (p["gamma"] / jnp.sqrt(p["var"] + eps)) + p["beta"]


def _conv1d_ref(x, w, b, stride, pad):
    B, L, _ = x.shape
    K, _, cout = w.shape
    l_out = (L + 2 * pad - K) // stride + 1
    xp = jnp.pad(x, ((0, 0), (pad, pad), (0, 0)))
    cols = []
    for t in range(l_out):
        acc = jnp.broadcast_to(b, (B, cout)).astype(jnp.float32)
        for j in range(K):
            acc = acc + xp[:, stride * t + j, :] @ w[j]
        cols.append(acc)
    return jnp.stack(cols, axis=1)


def _resblock_ref(x, p, stride, pad):
    out = jax.nn.relu(_bn_ref(x, p["bn1"]))
    out = out @ p["c1w"] + p["c1b"]
    out = jax.nn.relu(_bn_ref(out, p["bn2"]))
    out = _conv1d_ref(out, p["c2w"], p["c2b"], stride, pad)
    res = _bn_ref(_conv1d_ref(x, p["dw"], p["db"], stride, pad), p["dbn"])
    return res + 0.3 * out


def text_classifier_ref(x, raw):
    h = x @ raw["c1w"] + raw["c1b"]                 # conv1 (k=1), channels-last
    h = _resblock_ref(h, raw["rb1"], 2, 1)
    h = _resblock_ref(h, raw["rb4"], 2, 0)
    h = h.reshape(h.shape[0], -1)
    return jax.nn.sigmoid(h @ raw["lw"] + raw["lb"])


# ================================== main ====================================

if __name__ == "__main__":
    key = jax.random.PRNGKey(0)
    kx, kp = jax.random.split(key)
    x = jax.random.normal(kx, (BATCH, SEQ, NUM_FEATURES), jnp.float32)
    raw = init_raw_params(kp)
    wslab, vslab = pack_params(raw)

    fwd = jax.jit(text_classifier_forward)
    out = jax.block_until_ready(fwd(x, wslab, vslab))

    ref = jax.block_until_ready(text_classifier_ref(x, raw))
    np.testing.assert_allclose(np.asarray(out), np.asarray(ref),
                               rtol=5e-2, atol=3e-2)
    assert out.shape == (BATCH, 10)
    print("KERNEL_OK")
</pallas_src>

<mosaic_0001>
module attributes {stable_mosaic.version = 11 : i64} {
  func.func @_text_classifier_kernel(%arg0: memref<16x128xf32, #tpu.memory_space<vmem>>, %arg1: memref<3136x256xbf16, #tpu.memory_space<vmem>>, %arg2: memref<16x256xf32, #tpu.memory_space<vmem>>, %arg3: memref<2x128xf32, #tpu.memory_space<vmem>>) attributes {dimension_semantics = [], scalar_prefetch = 0 : i64, scratch_operands = 0 : i64, tpu.core_type = #tpu.core_type<tc>} {
    %c0 = arith.constant 0 : index
    %c0_0 = arith.constant 0 : index
    %0 = vector.load %arg2[%c0, %c0_0] : memref<16x256xf32, #tpu.memory_space<vmem>>, vector<16x256xf32>
    %c0_1 = arith.constant 0 : index
    %c0_2 = arith.constant 0 : index
    %1 = vector.load %arg0[%c0_1, %c0_2] : memref<16x128xf32, #tpu.memory_space<vmem>>, vector<16x128xf32>
    %c0_3 = arith.constant 0 : index
    %c0_4 = arith.constant 0 : index
    %2 = vector.load %arg1[%c0_3, %c0_4] : memref<3136x256xbf16, #tpu.memory_space<vmem>>, vector<128x128xbf16>
    %3 = vector.extract_strided_slice %0 {offsets = [0, 0], sizes = [1, 128], strides = [1, 1]} : vector<16x256xf32> to vector<1x128xf32>
    %4 = arith.truncf %1 : vector<16x128xf32> to vector<16x128xbf16>
    %cst = arith.constant dense<0.000000e+00> : vector<16x128xf32>
    %5 = tpu.matmul %4, %2, %cst {dimension_numbers = #tpu.dot_dimension_numbers<[1], [0], [0], [1], [0, 0, 1, 1], [], []>} : vector<16x128xbf16>, vector<128x128xbf16>, vector<16x128xf32> -> vector<16x128xf32>
    %6 = vector.broadcast %3 : vector<1x128xf32> to vector<16x128xf32>
    %7 = arith.addf %5, %6 : vector<16x128xf32>
    %8 = vector.extract_strided_slice %0 {offsets = [1, 0], sizes = [1, 128], strides = [1, 1]} : vector<16x256xf32> to vector<1x128xf32>
    %9 = vector.broadcast %8 : vector<1x128xf32> to vector<16x128xf32>
    %10 = arith.mulf %7, %9 : vector<16x128xf32>
    %11 = vector.extract_strided_slice %0 {offsets = [2, 0], sizes = [1, 128], strides = [1, 1]} : vector<16x256xf32> to vector<1x128xf32>
    %12 = vector.broadcast %11 : vector<1x128xf32> to vector<16x128xf32>
    %13 = arith.addf %10, %12 : vector<16x128xf32>
    %cst_5 = arith.constant 0.000000e+00 : f32
    %14 = vector.broadcast %cst_5 : f32 to vector<16x128xf32>
    %15 = arith.maximumf %13, %14 : vector<16x128xf32>
    %c128 = arith.constant 128 : index
    %c0_6 = arith.constant 0 : index
    %16 = vector.load %arg1[%c128, %c0_6] : memref<3136x256xbf16, #tpu.memory_space<vmem>>, vector<128x128xbf16>
    %17 = vector.extract_strided_slice %0 {offsets = [3, 0], sizes = [1, 128], strides = [1, 1]} : vector<16x256xf32> to vector<1x128xf32>
    %18 = arith.truncf %15 : vector<16x128xf32> to vector<16x128xbf16>
    %cst_7 = arith.constant dense<0.000000e+00> : vector<16x128xf32>
    %19 = tpu.matmul %18, %16, %cst_7 {dimension_numbers = #tpu.dot_dimension_numbers<[1], [0], [0], [1], [0, 0, 1, 1], [], []>} : vector<16x128xbf16>, vector<128x128xbf16>, vector<16x128xf32> -> vector<16x128xf32>
    %20 = vector.broadcast %17 : vector<1x128xf32> to vector<16x128xf32>
    %21 = arith.addf %19, %20 : vector<16x128xf32>
    %22 = vector.extract_strided_slice %0 {offsets = [4, 0], sizes = [1, 128], strides = [1, 1]} : vector<16x256xf32> to vector<1x128xf32>
    %23 = vector.broadcast %22 : vector<1x128xf32> to vector<16x128xf32>
    %24 = arith.mulf %21, %23 : vector<16x128xf32>
    %25 = vector.extract_strided_slice %0 {offsets = [5, 0], sizes = [1, 128], strides = [1, 1]} : vector<16x256xf32> to vector<1x128xf32>
    %26 = vector.broadcast %25 : vector<1x128xf32> to vector<16x128xf32>
    %27 = arith.addf %24, %26 : vector<16x128xf32>
    %cst_8 = arith.constant 0.000000e+00 : f32
    %28 = vector.broadcast %cst_8 : f32 to vector<16x128xf32>
    %29 = arith.maximumf %27, %28 : vector<16x128xf32>
    %cst_9 = arith.constant 0.000000e+00 : f32
    %30 = vector.broadcast %cst_9 : f32 to vector<1x128xf32>
    %31 = vector.extract_strided_slice %29 {offsets = [0, 0], sizes = [1, 128], strides = [1, 1]} : vector<16x128xf32> to vector<1x128xf32>
    %32 = vector.extract_strided_slice %29 {offsets = [1, 0], sizes = [1, 128], strides = [1, 1]} : vector<16x128xf32> to vector<1x128xf32>
    %33 = vector.extract_strided_slice %29 {offsets = [2, 0], sizes = [1, 128], strides = [1, 1]} : vector<16x128xf32> to vector<1x128xf32>
    %34 = tpu.concatenate %30, %31, %32, %33 in 1 : vector<1x128xf32>, vector<1x128xf32>, vector<1x128xf32>, vector<1x128xf32> -> vector<1x512xf32>
    %35 = vector.extract_strided_slice %29 {offsets = [1, 0], sizes = [1, 128], strides = [1, 1]} : vector<16x128xf32> to vector<1x128xf32>
    %36 = vector.extract_strided_slice %29 {offsets = [2, 0], sizes = [1, 128], strides = [1, 1]} : vector<16x128xf32> to vector<1x128xf32>
    %37 = vector.extract_strided_slice %29 {offsets = [3, 0], sizes = [1, 128], strides = [1, 1]} : vector<16x128xf32> to vector<1x128xf32>
    %38 = vector.extract_strided_slice %29 {offsets = [4, 0], sizes = [1, 128], strides = [1, 1]} : vector<16x128xf32> to vector<1x128xf32>
    %39 = tpu.concatenate %35, %36, %37, %38 in 1 : vector<1x128xf32>, vector<1x128xf32>, vector<1x128xf32>, vector<1x128xf32> -> vector<1x512xf32>
    %40 = vector.extract_strided_slice %29 {offsets = [3, 0], sizes = [1, 128], strides = [1, 1]} : vector<16x128xf32> to vector<1x128xf32>
    %41 = vector.extract_strided_slice %29 {offsets = [4, 0], sizes = [1, 128], strides = [1, 1]} : vector<16x128xf32> to vector<1x128xf32>
    %42 = vector.extract_strided_slice %29 {offsets = [5, 0], sizes = [1, 128], strides = [1, 1]} : vector<16x128xf32> to vector<1x128xf32>
    %43 = vector.extract_strided_slice %29 {offsets = [6, 0], sizes = [1, 128], strides = [1, 1]} : vector<16x128xf32> to vector<1x128xf32>
    %44 = tpu.concatenate %40, %41, %42, %43 in 1 : vector<1x128xf32>, vector<1x128xf32>, vector<1x128xf32>, vector<1x128xf32> -> vector<1x512xf32>
    %45 = vector.extract_strided_slice %29 {offsets = [5, 0], sizes = [1, 128], strides = [1, 1]} : vector<16x128xf32> to vector<1x128xf32>
    %46 = vector.extract_strided_slice %29 {offsets = [6, 0], sizes = [1, 128], strides = [1, 1]} : vector<16x128xf32> to vector<1x128xf32>
    %47 = vector.extract_strided_slice %29 {offsets = [7, 0], sizes = [1, 128], strides = [1, 1]} : vector<16x128xf32> to vector<1x128xf32>
    %48 = tpu.concatenate %45, %46, %47, %30 in 1 : vector<1x128xf32>, vector<1x128xf32>, vector<1x128xf32>, vector<1x128xf32> -> vector<1x512xf32>
    %49 = vector.extract_strided_slice %29 {offsets = [8, 0], sizes = [1, 128], strides = [1, 1]} : vector<16x128xf32> to vector<1x128xf32>
    %50 = vector.extract_strided_slice %29 {offsets = [9, 0], sizes = [1, 128], strides = [1, 1]} : vector<16x128xf32> to vector<1x128xf32>
    %51 = vector.extract_strided_slice %29 {offsets = [10, 0], sizes = [1, 128], strides = [1, 1]} : vector<16x128xf32> to vector<1x128xf32>
    %52 = tpu.concatenate %30, %49, %50, %51 in 1 : vector<1x128xf32>, vector<1x128xf32>, vector<1x128xf32>, vector<1x128xf32> -> vector<1x512xf32>
    %53 = vector.extract_strided_slice %29 {offsets = [9, 0], sizes = [1, 128], strides = [1, 1]} : vector<16x128xf32> to vector<1x128xf32>
    %54 = vector.extract_strided_slice %29 {offsets = [10, 0], sizes = [1, 128], strides = [1, 1]} : vector<16x128xf32> to vector<1x128xf32>
    %55 = vector.extract_strided_slice %29 {offsets = [11, 0], sizes = [1, 128], strides = [1, 1]} : vector<16x128xf32> to vector<1x128xf32>
    %56 = vector.extract_strided_slice %29 {offsets = [12, 0], sizes = [1, 128], strides = [1, 1]} : vector<16x128xf32> to vector<1x128xf32>
    %57 = tpu.concatenate %53, %54, %55, %56 in 1 : vector<1x128xf32>, vector<1x128xf32>, vector<1x128xf32>, vector<1x128xf32> -> vector<1x512xf32>
    %58 = vector.extract_strided_slice %29 {offsets = [11, 0], sizes = [1, 128], strides = [1, 1]} : vector<16x128xf32> to vector<1x128xf32>
    %59 = vector.extract_strided_slice %29 {offsets = [12, 0], sizes = [1, 128], strides = [1, 1]} : vector<16x128xf32> to vector<1x128xf32>
    %60 = vector.extract_strided_slice %29 {offsets = [13, 0], sizes = [1, 128], strides = [1, 1]} : vector<16x128xf32> to vector<1x128xf32>
    %61 = vector.extract_strided_slice %29 {offsets = [14, 0], sizes = [1, 128], strides = [1, 1]} : vector<16x128xf32> to vector<1x128xf32>
    %62 = tpu.concatenate %58, %59, %60, %61 in 1 : vector<1x128xf32>, vector<1x128xf32>, vector<1x128xf32>, vector<1x128xf32> -> vector<1x512xf32>
    %63 = vector.extract_strided_slice %29 {offsets = [13, 0], sizes = [1, 128], strides = [1, 1]} : vector<16x128xf32> to vector<1x128xf32>
    %64 = vector.extract_strided_slice %29 {offsets = [14, 0], sizes = [1, 128], strides = [1, 1]} : vector<16x128xf32> to vector<1x128xf32>
    %65 = vector.extract_strided_slice %29 {offsets = [15, 0], sizes = [1, 128], strides = [1, 1]} : vector<16x128xf32> to vector<1x128xf32>
    %66 = tpu.concatenate %63, %64, %65, %30 in 1 : vector<1x128xf32>, vector<1x128xf32>, vector<1x128xf32>, vector<1x128xf32> -> vector<1x512xf32>
    %67 = tpu.concatenate %34, %39, %44, %48, %52, %57, %62, %66 in 0 : vector<1x512xf32>, vector<1x512xf32>, vector<1x512xf32>, vector<1x512xf32>, vector<1x512xf32>, vector<1x512xf32>, vector<1x512xf32>, vector<1x512xf32> -> vector<8x512xf32>
    %cst_10 = arith.constant 0.000000e+00 : f32
    %68 = vector.broadcast %cst_10 : f32 to vector<1x128xf32>
    %69 = vector.extract_strided_slice %7 {offsets = [0, 0], sizes = [1, 128], strides = [1, 1]} : vector<16x128xf32> to vector<1x128xf32>
    %70 = vector.extract_strided_slice %7 {offsets = [1, 0], sizes = [1, 128], strides = [1, 1]} : vector<16x128xf32> to vector<1x128xf32>
    %71 = vector.extract_strided_slice %7 {offsets = [2, 0], sizes = [1, 128], strides = [1, 1]} : vector<16x128xf32> to vector<1x128xf32>
    %72 = tpu.concatenate %68, %69, %70, %71 in 1 : vector<1x128xf32>, vector<1x128xf32>, vector<1x128xf32>, vector<1x128xf32> -> vector<1x512xf32>
    %73 = vector.extract_strided_slice %7 {offsets = [1, 0], sizes = [1, 128], strides = [1, 1]} : vector<16x128xf32> to vector<1x128xf32>
    %74 = vector.extract_strided_slice %7 {offsets = [2, 0], sizes = [1, 128], strides = [1, 1]} : vector<16x128xf32> to vector<1x128xf32>
    %75 = vector.extract_strided_slice %7 {offsets = [3, 0], sizes = [1, 128], strides = [1, 1]} : vector<16x128xf32> to vector<1x128xf32>
    %76 = vector.extract_strided_slice %7 {offsets = [4, 0], sizes = [1, 128], strides = [1, 1]} : vector<16x128xf32> to vector<1x128xf32>
    %77 = tpu.concatenate %73, %74, %75, %76 in 1 : vector<1x128xf32>, vector<1x128xf32>, vector<1x128xf32>, vector<1x128xf32> -> vector<1x512xf32>
    %78 = vector.extract_strided_slice %7 {offsets = [3, 0], sizes = [1, 128], strides = [1, 1]} : vector<16x128xf32> to vector<1x128xf32>
    %79 = vector.extract_strided_slice %7 {offsets = [4, 0], sizes = [1, 128], strides = [1, 1]} : vector<16x128xf32> to vector<1x128xf32>
    %80 = vector.extract_strided_slice %7 {offsets = [5, 0], sizes = [1, 128], strides = [1, 1]} : vector<16x128xf32> to vector<1x128xf32>
    %81 = vector.extract_strided_slice %7 {offsets = [6, 0], sizes = [1, 128], strides = [1, 1]} : vector<16x128xf32> to vector<1x128xf32>
    %82 = tpu.concatenate %78, %79, %80, %81 in 1 : vector<1x128xf32>, vector<1x128xf32>, vector<1x128xf32>, vector<1x128xf32> -> vector<1x512xf32>
    %83 = vector.extract_strided_slice %7 {offsets = [5, 0], sizes = [1, 128], strides = [1, 1]} : vector<16x128xf32> to vector<1x128xf32>
    %84 = vector.extract_strided_slice %7 {offsets = [6, 0], sizes = [1, 128], strides = [1, 1]} : vector<16x128xf32> to vector<1x128xf32>
    %85 = vector.extract_strided_slice %7 {offsets = [7, 0], sizes = [1, 128], strides = [1, 1]} : vector<16x128xf32> to vector<1x128xf32>
    %86 = tpu.concatenate %83, %84, %85, %68 in 1 : vector<1x128xf32>, vector<1x128xf32>, vector<1x128xf32>, vector<1x128xf32> -> vector<1x512xf32>
    %87 = vector.extract_strided_slice %7 {offsets = [8, 0], sizes = [1, 128], strides = [1, 1]} : vector<16x128xf32> to vector<1x128xf32>
    %88 = vector.extract_strided_slice %7 {offsets = [9, 0], sizes = [1, 128], strides = [1, 1]} : vector<16x128xf32> to vector<1x128xf32>
    %89 = vector.extract_strided_slice %7 {offsets = [10, 0], sizes = [1, 128], strides = [1, 1]} : vector<16x128xf32> to vector<1x128xf32>
    %90 = tpu.concatenate %68, %87, %88, %89 in 1 : vector<1x128xf32>, vector<1x128xf32>, vector<1x128xf32>, vector<1x128xf32> -> vector<1x512xf32>
    %91 = vector.extract_strided_slice %7 {offsets = [9, 0], sizes = [1, 128], strides = [1, 1]} : vector<16x128xf32> to vector<1x128xf32>
    %92 = vector.extract_strided_slice %7 {offsets = [10, 0], sizes = [1, 128], strides = [1, 1]} : vector<16x128xf32> to vector<1x128xf32>
    %93 = vector.extract_strided_slice %7 {offsets = [11, 0], sizes = [1, 128], strides = [1, 1]} : vector<16x128xf32> to vector<1x128xf32>
    %94 = vector.extract_strided_slice %7 {offsets = [12, 0], sizes = [1, 128], strides = [1, 1]} : vector<16x128xf32> to vector<1x128xf32>
    %95 = tpu.concatenate %91, %92, %93, %94 in 1 : vector<1x128xf32>, vector<1x128xf32>, vector<1x128xf32>, vector<1x128xf32> -> vector<1x512xf32>
    %96 = vector.extract_strided_slice %7 {offsets = [11, 0], sizes = [1, 128], strides = [1, 1]} : vector<16x128xf32> to vector<1x128xf32>
    %97 = vector.extract_strided_slice %7 {offsets = [12, 0], sizes = [1, 128], strides = [1, 1]} : vector<16x128xf32> to vector<1x128xf32>
    %98 = vector.extract_strided_slice %7 {offsets = [13, 0], sizes = [1, 128], strides = [1, 1]} : vector<16x128xf32> to vector<1x128xf32>
    %99 = vector.extract_strided_slice %7 {offsets = [14, 0], sizes = [1, 128], strides = [1, 1]} : vector<16x128xf32> to vector<1x128xf32>
    %100 = tpu.concatenate %96, %97, %98, %99 in 1 : vector<1x128xf32>, vector<1x128xf32>, vector<1x128xf32>, vector<1x128xf32> -> vector<1x512xf32>
    %101 = vector.extract_strided_slice %7 {offsets = [13, 0], sizes = [1, 128], strides = [1, 1]} : vector<16x128xf32> to vector<1x128xf32>
    %102 = vector.extract_strided_slice %7 {offsets = [14, 0], sizes = [1, 128], strides = [1, 1]} : vector<16x128xf32> to vector<1x128xf32>
    %103 = vector.extract_strided_slice %7 {offsets = [15, 0], sizes = [1, 128], strides = [1, 1]} : vector<16x128xf32> to vector<1x128xf32>
    %104 = tpu.concatenate %101, %102, %103, %68 in 1 : vector<1x128xf32>, vector<1x128xf32>, vector<1x128xf32>, vector<1x128xf32> -> vector<1x512xf32>
    %105 = tpu.concatenate %72, %77, %82, %86, %90, %95, %100, %104 in 0 : vector<1x512xf32>, vector<1x512xf32>, vector<1x512xf32>, vector<1x512xf32>, vector<1x512xf32>, vector<1x512xf32>, vector<1x512xf32>, vector<1x512xf32> -> vector<8x512xf32>
    %106 = tpu.concatenate %67, %105 in 1 : vector<8x512xf32>, vector<8x512xf32> -> vector<8x1024xf32>
    %c256 = arith.constant 256 : index
    %c0_11 = arith.constant 0 : index
    %107 = vector.load %arg1[%c256, %c0_11] : memref<3136x256xbf16, #tpu.memory_space<vmem>>, vector<1024x192xbf16>
    %108 = vector.extract_strided_slice %0 {offsets = [6, 0], sizes = [1, 192], strides = [1, 1]} : vector<16x256xf32> to vector<1x192xf32>
    %109 = arith.truncf %106 : vector<8x1024xf32> to vector<8x1024xbf16>
    %cst_12 = arith.constant dense<0.000000e+00> : vector<8x192xf32>
    %110 = tpu.matmul %109, %107, %cst_12 {dimension_numbers = #tpu.dot_dimension_numbers<[1], [0], [0], [1], [0, 0, 1, 1], [], []>} : vector<8x1024xbf16>, vector<1024x192xbf16>, vector<8x192xf32> -> vector<8x192xf32>
    %111 = vector.broadcast %108 : vector<1x192xf32> to vector<8x192xf32>
    %112 = arith.addf %110, %111 : vector<8x192xf32>
    %113 = vector.extract_strided_slice %0 {offsets = [7, 0], sizes = [1, 192], strides = [1, 1]} : vector<16x256xf32> to vector<1x192xf32>
    %114 = vector.broadcast %113 : vector<1x192xf32> to vector<8x192xf32>
    %115 = arith.mulf %112, %114 : vector<8x192xf32>
    %116 = vector.extract_strided_slice %0 {offsets = [8, 0], sizes = [1, 192], strides = [1, 1]} : vector<16x256xf32> to vector<1x192xf32>
    %117 = vector.broadcast %116 : vector<1x192xf32> to vector<8x192xf32>
    %118 = arith.addf %115, %117 : vector<8x192xf32>
    %cst_13 = arith.constant 0.000000e+00 : f32
    %119 = vector.broadcast %cst_13 : f32 to vector<8x192xf32>
    %120 = arith.maximumf %118, %119 : vector<8x192xf32>
    %c1280 = arith.constant 1280 : index
    %c0_14 = arith.constant 0 : index
    %121 = vector.load %arg1[%c1280, %c0_14] : memref<3136x256xbf16, #tpu.memory_space<vmem>>, vector<192x192xbf16>
    %122 = vector.extract_strided_slice %0 {offsets = [9, 0], sizes = [1, 192], strides = [1, 1]} : vector<16x256xf32> to vector<1x192xf32>
    %123 = arith.truncf %120 : vector<8x192xf32> to vector<8x192xbf16>
    %cst_15 = arith.constant dense<0.000000e+00> : vector<8x192xf32>
    %124 = tpu.matmul %123, %121, %cst_15 {dimension_numbers = #tpu.dot_dimension_numbers<[1], [0], [0], [1], [0, 0, 1, 1], [], []>} : vector<8x192xbf16>, vector<192x192xbf16>, vector<8x192xf32> -> vector<8x192xf32>
    %125 = vector.broadcast %122 : vector<1x192xf32> to vector<8x192xf32>
    %126 = arith.addf %124, %125 : vector<8x192xf32>
    %127 = vector.extract_strided_slice %0 {offsets = [10, 0], sizes = [1, 192], strides = [1, 1]} : vector<16x256xf32> to vector<1x192xf32>
    %128 = vector.broadcast %127 : vector<1x192xf32> to vector<8x192xf32>
    %129 = arith.mulf %126, %128 : vector<8x192xf32>
    %130 = vector.extract_strided_slice %0 {offsets = [11, 0], sizes = [1, 192], strides = [1, 1]} : vector<16x256xf32> to vector<1x192xf32>
    %131 = vector.broadcast %130 : vector<1x192xf32> to vector<8x192xf32>
    %132 = arith.addf %129, %131 : vector<8x192xf32>
    %cst_16 = arith.constant 0.000000e+00 : f32
    %133 = vector.broadcast %cst_16 : f32 to vector<8x192xf32>
    %134 = arith.maximumf %132, %133 : vector<8x192xf32>
    %135 = vector.extract_strided_slice %134 {offsets = [0, 0], sizes = [1, 192], strides = [1, 1]} : vector<8x192xf32> to vector<1x192xf32>
    %136 = vector.extract_strided_slice %134 {offsets = [1, 0], sizes = [1, 192], strides = [1, 1]} : vector<8x192xf32> to vector<1x192xf32>
    %137 = vector.extract_strided_slice %134 {offsets = [2, 0], sizes = [1, 192], strides = [1, 1]} : vector<8x192xf32> to vector<1x192xf32>
    %138 = vector.extract_strided_slice %134 {offsets = [3, 0], sizes = [1, 192], strides = [1, 1]} : vector<8x192xf32> to vector<1x192xf32>
    %139 = tpu.concatenate %135, %136, %137, %138 in 1 : vector<1x192xf32>, vector<1x192xf32>, vector<1x192xf32>, vector<1x192xf32> -> vector<1x768xf32>
    %140 = vector.extract_strided_slice %134 {offsets = [4, 0], sizes = [1, 192], strides = [1, 1]} : vector<8x192xf32> to vector<1x192xf32>
    %141 = vector.extract_strided_slice %134 {offsets = [5, 0], sizes = [1, 192], strides = [1, 1]} : vector<8x192xf32> to vector<1x192xf32>
    %142 = vector.extract_strided_slice %134 {offsets = [6, 0], sizes = [1, 192], strides = [1, 1]} : vector<8x192xf32> to vector<1x192xf32>
    %143 = vector.extract_strided_slice %134 {offsets = [7, 0], sizes = [1, 192], strides = [1, 1]} : vector<8x192xf32> to vector<1x192xf32>
    %144 = tpu.concatenate %140, %141, %142, %143 in 1 : vector<1x192xf32>, vector<1x192xf32>, vector<1x192xf32>, vector<1x192xf32> -> vector<1x768xf32>
    %145 = tpu.concatenate %139, %144 in 0 : vector<1x768xf32>, vector<1x768xf32> -> vector<2x768xf32>
    %146 = vector.extract_strided_slice %112 {offsets = [0, 0], sizes = [1, 192], strides = [1, 1]} : vector<8x192xf32> to vector<1x192xf32>
    %147 = vector.extract_strided_slice %112 {offsets = [1, 0], sizes = [1, 192], strides = [1, 1]} : vector<8x192xf32> to vector<1x192xf32>
    %148 = vector.extract_strided_slice %112 {offsets = [2, 0], sizes = [1, 192], strides = [1, 1]} : vector<8x192xf32> to vector<1x192xf32>
    %149 = vector.extract_strided_slice %112 {offsets = [3, 0], sizes = [1, 192], strides = [1, 1]} : vector<8x192xf32> to vector<1x192xf32>
    %150 = tpu.concatenate %146, %147, %148, %149 in 1 : vector<1x192xf32>, vector<1x192xf32>, vector<1x192xf32>, vector<1x192xf32> -> vector<1x768xf32>
    %151 = vector.extract_strided_slice %112 {offsets = [4, 0], sizes = [1, 192], strides = [1, 1]} : vector<8x192xf32> to vector<1x192xf32>
    %152 = vector.extract_strided_slice %112 {offsets = [5, 0], sizes = [1, 192], strides = [1, 1]} : vector<8x192xf32> to vector<1x192xf32>
    %153 = vector.extract_strided_slice %112 {offsets = [6, 0], sizes = [1, 192], strides = [1, 1]} : vector<8x192xf32> to vector<1x192xf32>
    %154 = vector.extract_strided_slice %112 {offsets = [7, 0], sizes = [1, 192], strides = [1, 1]} : vector<8x192xf32> to vector<1x192xf32>
    %155 = tpu.concatenate %151, %152, %153, %154 in 1 : vector<1x192xf32>, vector<1x192xf32>, vector<1x192xf32>, vector<1x192xf32> -> vector<1x768xf32>
    %156 = tpu.concatenate %150, %155 in 0 : vector<1x768xf32>, vector<1x768xf32> -> vector<2x768xf32>
    %157 = tpu.concatenate %145, %156 in 1 : vector<2x768xf32>, vector<2x768xf32> -> vector<2x1536xf32>
    %c1472 = arith.constant 1472 : index
    %c0_17 = arith.constant 0 : index
    %158 = vector.load %arg1[%c1472, %c0_17] : memref<3136x256xbf16, #tpu.memory_space<vmem>>, vector<1536x128xbf16>
    %159 = vector.extract_strided_slice %0 {offsets = [12, 0], sizes = [1, 128], strides = [1, 1]} : vector<16x256xf32> to vector<1x128xf32>
    %160 = arith.truncf %157 : vector<2x1536xf32> to vector<2x1536xbf16>
    %cst_18 = arith.constant dense<0.000000e+00> : vector<2x128xf32>
    %161 = tpu.matmul %160, %158, %cst_18 {dimension_numbers = #tpu.dot_dimension_numbers<[1], [0], [0], [1], [0, 0, 1, 1], [], []>} : vector<2x1536xbf16>, vector<1536x128xbf16>, vector<2x128xf32> -> vector<2x128xf32>
    %162 = vector.broadcast %159 : vector<1x128xf32> to vector<2x128xf32>
    %163 = arith.addf %161, %162 : vector<2x128xf32>
    %c3008 = arith.constant 3008 : index
    %c0_19 = arith.constant 0 : index
    %164 = vector.load %arg1[%c3008, %c0_19] : memref<3136x256xbf16, #tpu.memory_space<vmem>>, vector<128x128xbf16>
    %165 = vector.extract_strided_slice %0 {offsets = [13, 0], sizes = [1, 128], strides = [1, 1]} : vector<16x256xf32> to vector<1x128xf32>
    %166 = arith.truncf %163 : vector<2x128xf32> to vector<2x128xbf16>
    %cst_20 = arith.constant dense<0.000000e+00> : vector<2x128xf32>
    %167 = tpu.matmul %166, %164, %cst_20 {dimension_numbers = #tpu.dot_dimension_numbers<[1], [0], [0], [1], [0, 0, 1, 1], [], []>} : vector<2x128xbf16>, vector<128x128xbf16>, vector<2x128xf32> -> vector<2x128xf32>
    %168 = vector.broadcast %165 : vector<1x128xf32> to vector<2x128xf32>
    %169 = arith.addf %167, %168 : vector<2x128xf32>
    %170 = arith.negf %169 : vector<2x128xf32>
    %171 = math.exp %170 : vector<2x128xf32>
    %cst_21 = arith.constant 1.000000e+00 : f32
    %172 = vector.broadcast %cst_21 : f32 to vector<2x128xf32>
    %173 = arith.addf %172, %171 : vector<2x128xf32>
    %174 = arith.divf %172, %173 : vector<2x128xf32>
    %c0_22 = arith.constant 0 : index
    %c0_23 = arith.constant 0 : index
    %175 = vector.load %arg3[%c0_22, %c0_23] : memref<2x128xf32, #tpu.memory_space<vmem>>, vector<2x128xf32>
    tpu.vector_store %arg3[%c0_22, %c0_23], %174 {strides = array<i32>} : memref<2x128xf32, #tpu.memory_space<vmem>>, vector<2x128xf32>,
    return
  }
}

</mosaic_0001>

<bundles_post_ra>
// kernel: text_classifier_forward.1
= control target key start
LH: loop header
LB: loop body
LE: loop exit
PB: predicated region body
PF: predicated region fallthrough
CT: control target
= control target key end

     0   :  { %8 = vsyncpa [#allocation3], 0  ;;  %s4149_s0 = inlined_call_operand.vmem [shape: f32[16,128], index: 0, kind: input, shape index: {}]   ;;  %s4150_s1 = inlined_call_operand.hbm [shape: bf16[3136,256], index: 1, kind: input, shape index: {}]   ;;  %s4151_s2 = inlined_call_operand.hbm [shape: f32[16,256], index: 2, kind: input, shape index: {}]   ;;  %s4152_s3 = inlined_call_operand.hbm [shape: f32[2,128], index: 3, kind: output, shape index: {}]  }
   0x1   :  { %9 = vsyncpa [#allocation6], 0 }
   0x2   :  { %10 = vsyncpa [#allocation4], 0  ;;  %s3842_s12 = smov [#allocation2]   ;;  %s3770_s16 = scalar_lea.hbm %s4150_s1, 50176 }
   0x3   :  { %s18_s13 = sshll.u32 %s3842_s12, 4  ;;  %p3771_p0 = scmp.ne.s32.totalorder %s4150_s1, %s3770_s16  ;;  %s19_s13 = int_to_ptr.vmem [resolvable:$true] %s18_s13 }
   0x4   :  { %p3774_p1 = scmp.lt.u32.totalorder %s3770_s16, %s4150_s1 }
   0x6   :  { %p3776_p2 = pnand %p3774_p1, %p3771_p0 }
   0x8   :  { %3779 = shalt.err (!%p3776_p2)
}
   0x9   :  { %s3780_s21 = scalar_lea.vmem %s19_s13, 50176  ;;  %p3785_p4 = scmp.lt.s32.totalorder %s19_s13, %s19_s13 }
   0xa   :  { %p3781_p3 = scmp.ne.s32.totalorder %s19_s13, %s3780_s21  ;;  %p3786_p5 = scmp.lt.s32.totalorder %s3780_s21, %s3780_s21 }
   0xc   :  { %p3787_p6 = por %p3786_p5, %p3785_p4 }
   0xe   :  { %p3788_p7 = pnand %p3787_p6, %p3781_p3 }
  0x10   :  { %3791 = shalt.err (!%p3788_p7)
}
  0x11   :  { %s3843_s22 = smov 128   ;;  %s3844_s23 = smov 8  }
  0x12   :  { %24 = dma.hbm_to_vmem [thread:$0]  %s4150_s1, 50176, %s19_s13, [#allocation3], %s3843_s22, %s3843_s22, %s3844_s23  }
  0x13   :  { %s3845_s26 = smov [#allocation5]   ;;  %s3792_s30 = scalar_lea.hbm %s4151_s2, 512 }
  0x14   :  { %s30_s27 = sshll.u32 %s3845_s26, 4  ;;  %p3793_p8 = scmp.ne.s32.totalorder %s4151_s2, %s3792_s30  ;;  %s31_s27 = int_to_ptr.vmem [resolvable:$true] %s30_s27 }
  0x15   :  { %p3796_p9 = scmp.lt.u32.totalorder %s3792_s30, %s4151_s2 }
  0x17   :  { %p3798_p10 = pnand %p3796_p9, %p3793_p8 }
  0x19   :  { %3801 = shalt.err (!%p3798_p10)
}
  0x1a   :  { %s3802_s8 = scalar_lea.vmem %s31_s27, 512  ;;  %p3807_p12 = scmp.lt.s32.totalorder %s31_s27, %s31_s27 }
  0x1b   :  { %p3803_p11 = scmp.ne.s32.totalorder %s31_s27, %s3802_s8  ;;  %p3808_p13 = scmp.lt.s32.totalorder %s3802_s8, %s3802_s8 }
  0x1d   :  { %p3809_p0 = por %p3808_p13, %p3807_p12 }
  0x1f   :  { %p3810_p1 = pnand %p3809_p0, %p3803_p11 }
  0x21   :  { %3813 = shalt.err (!%p3810_p1)
}
  0x22   :  { %s3846_s1 = smov 256   ;;  %s3847_s9 = smov 16  }
  0x23   :  { %36 = dma.hbm_to_vmem [thread:$0]  %s4151_s2, 512, %s31_s27, [#allocation6], %s3846_s1, %s3846_s1, %s3847_s9  }
  0x24   :  { %3836 = dma.done.wait [#allocation3], 50176  }
  0x25   :  { %3837 = vsyncadd [#allocation3], 4294917120 }
  0x26   :  { %3838 = dma.done.wait [#allocation6], 512  }
  0x27   :  { %3839 = vsyncadd [#allocation6], 4294966784  ;;  %v3848_v0 = vmov 0.0   ;;  %vm3849_vm0 = vmmov 0   ;;  %v3418_v1 = vld [vmem:[#allocation2] ss:$8 sps:$4 sm:$0xff]   ;;  %v67_v42 = vlaneseq }
  0x28   :  { %3324 = vmatprep.subr.bf16.mxu0 %v3848_v0  ;;  %3340 = vmatprep.mubr.msk.bf16.mxu0 %vm3849_vm0, %v3848_v0  ;;  %v3419_v2 = vld [vmem:[#allocation2 + $0x10] ss:$8 sps:$4 sm:$0xff]   ;;  %v3420_v3 = vld [vmem:[#allocation2 + $0x20] ss:$8 sps:$4 sm:$0xff]   ;;  %v3436_v21 = vld [vmem:[#allocation2 + $0x104] ss:$8 sps:$4 sm:$0xff]  }
  0x29   :  { %3344 = vmatprep.subr.bf16.mxu1 %v3848_v0  ;;  %3360 = vmatprep.mubr.msk.bf16.mxu1 %vm3849_vm0, %v3848_v0  ;;  %v3426_v4 = vld [vmem:[#allocation2 + $0x80] ss:$8 sps:$4 sm:$0xff]   ;;  %v3421_v5 = vld [vmem:[#allocation2 + $0x30] ss:$8 sps:$4 sm:$0xff]   ;;  %v3439_v22 = vld [vmem:[#allocation2 + $0x114] ss:$8 sps:$4 sm:$0xff]  }
  0x2a   :  { %3325 = vmatpush3.bf16.msra.mxu0 %v3418_v1  ;;  %3345 = vmatpush3.bf16.msra.mxu1 %v3426_v4  ;;  %v3427_v6 = vld [vmem:[#allocation2 + $0x90] ss:$8 sps:$4 sm:$0xff]   ;;  %v3422_v7 = vld [vmem:[#allocation2 + $0x40] ss:$8 sps:$4 sm:$0xff]   ;;  %v3442_v24 = vld [vmem:[#allocation2 + $0x124] ss:$8 sps:$4 sm:$0xff]  }
  0x2b   :  { %3326 = vmatprep.subr.bf16.mxu0 %v3848_v0  ;;  %3346 = vmatprep.subr.bf16.mxu1 %v3848_v0  ;;  %v3428_v8 = vld [vmem:[#allocation2 + $0xa0] ss:$8 sps:$4 sm:$0xff]   ;;  %v3423_v9 = vld [vmem:[#allocation2 + $0x50] ss:$8 sps:$4 sm:$0xff]   ;;  %v3445_v26 = vld [vmem:[#allocation2 + $0x134] ss:$8 sps:$4 sm:$0xff]  }
  0x2c   :  { %v3429_v10 = vld [vmem:[#allocation2 + $0xb0] ss:$8 sps:$4 sm:$0xff]   ;;  %v3424_v11 = vld [vmem:[#allocation2 + $0x60] ss:$8 sps:$4 sm:$0xff]   ;;  %v3448_v28 = vld [vmem:[#allocation2 + $0x144] ss:$8 sps:$4 sm:$0xff]  }
  0x2d   :  { %v3430_v12 = vld [vmem:[#allocation2 + $0xc0] ss:$8 sps:$4 sm:$0xff]   ;;  %v3425_v13 = vld [vmem:[#allocation2 + $0x70] ss:$8 sps:$4 sm:$0xff]   ;;  %v3451_v30 = vld [vmem:[#allocation2 + $0x154] ss:$8 sps:$4 sm:$0xff]  }
  0x2e   :  { %3327 = vmatpush3.bf16.msra.mxu0 %v3419_v2  ;;  %3347 = vmatpush3.bf16.msra.mxu1 %v3427_v6  ;;  %v48_v14 = vld [vmem:[%s4149_s0] sm:$0xff]  ;;  %v49_v15 = vld [vmem:[%s4149_s0 + $0x8] sm:$0xff]  ;;  %v3431_v17 = vld [vmem:[#allocation2 + $0xd0] ss:$8 sps:$4 sm:$0xff]   ;;  %v3922_v43 = vshrl.u32 %v67_v42, 7  ;;  %vm348_vm1 = vcmask 1040384  }
  0x2f   :  { %3328 = vmatprep.subr.bf16.mxu0 %v3848_v0  ;;  %3348 = vmatprep.subr.bf16.mxu1 %v3848_v0  ;;  %v66_v16 = vpack.c.bf16 %v49_v15, %v48_v14  ;;  %v3432_v18 = vld [vmem:[#allocation2 + $0xe0] ss:$8 sps:$4 sm:$0xff]   ;;  %v3433_v19 = vld [vmem:[#allocation2 + $0xf0] ss:$8 sps:$4 sm:$0xff]   ;;  %v3454_v32 = vld [vmem:[#allocation2 + $0x164] ss:$8 sps:$4 sm:$0xff]  }
  0x30   :  { %v3434_v20 = vld [vmem:[#allocation2 + $0x100] ss:$8 sps:$4 sm:$0xff]   ;;  %v3437_v23 = vld [vmem:[#allocation2 + $0x110] ss:$8 sps:$4 sm:$0xff]   ;;  %v3457_v34 = vld [vmem:[#allocation2 + $0x174] ss:$8 sps:$4 sm:$0xff]  }
  0x31   :  { %v3440_v25 = vld [vmem:[#allocation2 + $0x120] ss:$8 sps:$4 sm:$0xff]   ;;  %v3443_v27 = vld [vmem:[#allocation2 + $0x130] ss:$8 sps:$4 sm:$0xff]   ;;  %v3460_v36 = vld [vmem:[#allocation2 + $0x184] ss:$8 sps:$4 sm:$0xff]  }
  0x32   :  { %3329 = vmatpush3.bf16.msra.mxu0 %v3420_v3  ;;  %3349 = vmatpush3.bf16.msra.mxu1 %v3428_v8  ;;  %v3446_v29 = vld [vmem:[#allocation2 + $0x140] ss:$8 sps:$4 sm:$0xff]   ;;  %v3449_v31 = vld [vmem:[#allocation2 + $0x150] ss:$8 sps:$4 sm:$0xff]   ;;  %v3463_v38 = vld [vmem:[#allocation2 + $0x194] ss:$8 sps:$4 sm:$0xff]  }
  0x33   :  { %3330 = vmatprep.subr.bf16.mxu0 %v3848_v0  ;;  %3350 = vmatprep.subr.bf16.mxu1 %v3848_v0  ;;  %v3452_v33 = vld [vmem:[#allocation2 + $0x160] ss:$8 sps:$4 sm:$0xff]   ;;  %v3455_v35 = vld [vmem:[#allocation2 + $0x170] ss:$8 sps:$4 sm:$0xff]   ;;  %v3466_v40 = vld [vmem:[#allocation2 + $0x1a4] ss:$8 sps:$4 sm:$0xff]  }
  0x34   :  { %v3458_v37 = vld [vmem:[#allocation2 + $0x180] ss:$8 sps:$4 sm:$0xff]   ;;  %v3461_v39 = vld [vmem:[#allocation2 + $0x190] ss:$8 sps:$4 sm:$0xff]   ;;  %v3925_v44 = vsub.s32 0, %v3922_v43  ;;  %v3930_v46 = vsub.s32 1, %v3922_v43 }
  0x35   :  { %v3464_v41 = vld [vmem:[#allocation2 + $0x1a0] ss:$8 sps:$4 sm:$0xff]   ;;  %v3935_v48 = vsub.s32 2, %v3922_v43  ;;  %vm353_vm2 = vcmask 1041408   ;;  %vm358_vm3 = vcmask 1042432   ;;  %vm363_vm4 = vcmask 1043456  }
  0x36   :  { %3331 = vmatpush3.bf16.msra.mxu0 %v3421_v5  ;;  %3351 = vmatpush3.bf16.msra.mxu1 %v3429_v10  ;;  %v3927_v45 = vld [vmem:[#allocation5] sm:$0xff]  ;;  %vm368_vm5 = vcmask 1044480   ;;  %v3942_v55 = vrot.slane %v3848_v0, 4  ;;  %vm373_vm6 = vcmask 1045504   ;;  %vm378_vm7 = vcmask 1046528   ;;  %s3850_s0 = smov 64  }
  0x37   :  { %3332 = vmatprep.subr.bf16.mxu0 %v3848_v0  ;;  %3352 = vmatprep.subr.bf16.mxu1 %v3848_v0  ;;  %v70_v47 = vrot.slane %v3927_v45, %v3925_v44  ;;  %v163_v50 = vrot.slane %v3927_v45, %v3930_v46  ;;  %v169_v53 = vrot.slane %v3927_v45, %v3935_v48  ;;  %v3946_v62 = vrot.slane %v3848_v0, 2  ;;  %s3851_s15 = smov [#allocation7]  }
  0x38   :  { %vm1578_vm8 = vcmask 523264   ;;  %s2881_s16 = sshll.u32 %s3851_s15, 4  ;;  %s2882_s16 = int_to_ptr.vmem [resolvable:$true] %s2881_s16 }
  0x39   :  { %s3814_s17 = scalar_lea.vmem %s2882_s16, 32  ;;  %p3819_p3 = scmp.lt.s32.totalorder %s2882_s16, %s2882_s16 }
  0x3a   :  { %3333 = vmatpush3.bf16.msra.mxu0 %v3422_v7  ;;  %3353 = vmatpush3.bf16.msra.mxu1 %v3430_v12  ;;  %p3815_p2 = scmp.ne.s32.totalorder %s2882_s16, %s3814_s17  ;;  %p3820_p4 = scmp.lt.s32.totalorder %s3814_s17, %s3814_s17 }
  0x3b   :  { %3334 = vmatprep.subr.bf16.mxu0 %v3848_v0  ;;  %3354 = vmatprep.subr.bf16.mxu1 %v3848_v0 }
  0x3c   :  { %p3821_p5 = por %p3820_p4, %p3819_p3 }
  0x3e   :  { %3335 = vmatpush3.bf16.msra.mxu0 %v3423_v9  ;;  %3355 = vmatpush3.bf16.msra.mxu1 %v3431_v17  ;;  %p3822_p6 = pnand %p3821_p5, %p3815_p2 }
  0x3f   :  { %3336 = vmatprep.subr.bf16.mxu0 %v3848_v0  ;;  %3356 = vmatprep.subr.bf16.mxu1 %v3848_v0 }
  0x42   :  { %3337 = vmatpush3.bf16.msra.mxu0 %v3424_v11  ;;  %3357 = vmatpush3.bf16.msra.mxu1 %v3432_v18 }
  0x43   :  { %3338 = vmatprep.subr.bf16.mxu0 %v3848_v0  ;;  %3358 = vmatprep.subr.bf16.mxu1 %v3848_v0 }
  0x46   :  { %3339 = vmatpush3.bf16.msra.mxu0 %v3425_v13  ;;  %3359 = vmatpush3.bf16.msra.mxu1 %v3433_v19 }
  0x47   :  { %1238 = vmatprep.subr.bf16.mxu0 %v3436_v21 }
  0x49   :  { %3341 = vmatmul.mubr.bf16.vlgmr.msra.gmra.mrb[0].mxu0 %v66_v16 }
  0x4a   :  { %1239 = vmatpush1.bf16.msra.mxu0 %v3434_v20 }
  0x4b   :  { %1240 = vmatprep.subr.bf16.mxu0 %v3439_v22 }
  0x4e   :  { %1241 = vmatpush1.bf16.msra.mxu0 %v3437_v23 }
  0x4f   :  { %1242 = vmatprep.subr.bf16.mxu0 %v3442_v24 }
  0x52   :  { %1243 = vmatpush1.bf16.msra.mxu0 %v3440_v25 }
  0x53   :  { %1244 = vmatprep.subr.bf16.mxu0 %v3445_v26 }
  0x56   :  { %1245 = vmatpush1.bf16.msra.mxu0 %v3443_v27 }
  0x57   :  { %1246 = vmatprep.subr.bf16.mxu0 %v3448_v28 }
  0x5a   :  { %1247 = vmatpush1.bf16.msra.mxu0 %v3446_v29 }
  0x5b   :  { %1248 = vmatprep.subr.bf16.mxu0 %v3451_v30 }
  0x5e   :  { %1249 = vmatpush1.bf16.msra.mxu0 %v3449_v31 }
  0x5f   :  { %1250 = vmatprep.subr.bf16.mxu0 %v3454_v32 }
  0x62   :  { %1251 = vmatpush1.bf16.msra.mxu0 %v3452_v33 }
  0x63   :  { %1252 = vmatprep.subr.bf16.mxu0 %v3457_v34 }
  0x66   :  { %1253 = vmatpush1.bf16.msra.mxu0 %v3455_v35 }
  0x67   :  { %1254 = vmatprep.subr.bf16.mxu0 %v3460_v36 }
  0x6a   :  { %1255 = vmatpush1.bf16.msra.mxu0 %v3458_v37 }
  0x6b   :  { %1256 = vmatprep.subr.bf16.mxu0 %v3463_v38 }
  0x6e   :  { %1257 = vmatpush1.bf16.msra.mxu0 %v3461_v39 }
  0x6f   :  { %1258 = vmatprep.subr.bf16.mxu0 %v3466_v40 }
  0x72   :  { %1259 = vmatpush1.bf16.msra.mxu0 %v3464_v41 }
 0x11c   :  { %v153_v49 = vpop.f32.mrb[0].mxu0 }
 0x11d   :  { %v154_v51 = vadd.f32 %v153_v49, %v70_v47  ;;  %v3342_v52 = vpop.f32.mrb[1].mxu0 }
 0x11e   :  { %v156_v54 = vpop.f32.mrb[2].mxu0 }
 0x11f   :  { %v384_v56 = vrot.slane %v154_v51, 1  ;;  %v386_v57 = vrot.slane %v154_v51, 2  ;;  %v426_v58 = vsel %vm348_vm1, 0.0, %v154_v51  ;;  %v3343_v59 = vpop.f32.mrb[3].mxu0  ;;  %v157_v60 = vadd.f32 %v156_v54, %v70_v47 }
 0x120   :  { %v164_v61 = vmul.f32 %v163_v50, %v154_v51  ;;  %v388_v8 = vrot.slane %v154_v51, 3  ;;  %v3467_v59 = vld [vmem:[#allocation2 + $0x1b0] ss:$8 sps:$4 sm:$0xff]  }
 0x121   :  { %v394_v63 = vrot.slane %v384_v56, 1  ;;  %v400_v1 = vrot.slane %v384_v56, 2  ;;  %v427_v2 = vsel %vm348_vm1, %v154_v51, %v384_v56  ;;  %v430_v3 = vsel %vm353_vm2, %v426_v58, %v384_v56  ;;  %v3469_v58 = vld [vmem:[#allocation2 + $0x1b4] ss:$8 sps:$4 sm:$0xff]  }
 0x122   :  { %v165_v4 = vmul.f32 %v163_v50, %v157_v60  ;;  %v170_v5 = vadd.f32 %v169_v53, %v164_v61  ;;  %v391_v6 = vrot.slane %v157_v60, 1  ;;  %v404_v7 = vrot.slane %v157_v60, 4  ;;  %1260 = vmatprep.subr.bf16.mxu0 %v3469_v58  ;;  %v3470_v61 = vld [vmem:[#allocation2 + $0x1c0] ss:$8 sps:$4 sm:$0xff]  }
 0x123   :  { %v431_v9 = vsel %vm353_vm2, %v427_v2, %v394_v63  ;;  %v412_v10 = vrot.slane %v157_v60, 5  ;;  %v434_v11 = vsel %vm358_vm3, %v430_v3, %v386_v57  ;;  %v420_v15 = vrot.slane %v157_v60, 6  ;;  %1261 = vmatpush1.bf16.msra.mxu0 %v3467_v59  ;;  %v3475_v63 = vld [vmem:[#allocation2 + $0x1d4] ss:$8 sps:$4 sm:$0xff]   ;;  %v3476_v2 = vld [vmem:[#allocation2 + $0x1e0] ss:$8 sps:$4 sm:$0xff]  }
 0x124   :  { %v171_v12 = vadd.f32 %v169_v53, %v165_v4  ;;  %v172_v13 = vmax.f32 %v170_v5, 0.0  ;;  %v405_v14 = vrot.slane %v391_v6, 4  ;;  %v413_v16 = vrot.slane %v391_v6, 5  ;;  %v3478_v3 = vld [vmem:[#allocation2 + $0x1e4] ss:$8 sps:$4 sm:$0xff]  }
 0x125   :  { %v435_v17 = vsel %vm358_vm3, %v431_v9, %v400_v1  ;;  %v438_v18 = vsel %vm363_vm4, %v434_v11, %v3942_v55  ;;  %v392_v19 = vrot.slane %v157_v60, 2  ;;  %v393_v23 = vrot.slane %v157_v60, 3  ;;  %v3472_v60 = vld [vmem:[#allocation2 + $0x1c4] ss:$8 sps:$4 sm:$0xff]   ;;  %v3473_v1 = vld [vmem:[#allocation2 + $0x1d0] ss:$8 sps:$4 sm:$0xff]  }
 0x126   :  { %v173_v20 = vmax.f32 %v171_v12, 0.0  ;;  %v439_v21 = vsel %vm363_vm4, %v435_v17, %v404_v7  ;;  %v442_v22 = vsel %vm368_vm5, %v438_v18, %v404_v7  ;;  %v421_v24 = vrot.slane %v391_v6, 6  ;;  %1262 = vmatprep.subr.bf16.mxu0 %v3472_v60  ;;  %v3481_v4 = vld [vmem:[#allocation2 + $0x1f4] ss:$8 sps:$4 sm:$0xff]   ;;  %v3479_v5 = vld [vmem:[#allocation2 + $0x1f0] ss:$8 sps:$4 sm:$0xff]  }
 0x127   :  { %v443_v25 = vsel %vm368_vm5, %v439_v21, %v405_v14  ;;  %v446_v26 = vsel %vm373_vm6, %v442_v22, %v412_v10  ;;  %v396_v27 = vrot.slane %v388_v8, 1  ;;  %v406_v31 = vrot.slane %v392_v19, 4  ;;  %1263 = vmatpush1.bf16.msra.mxu0 %v3470_v61  ;;  %v3484_v6 = vld [vmem:[#allocation2 + $0x204] ss:$8 sps:$4 sm:$0xff]  }
 0x128   :  { %v190_v28 = vpack.c.bf16 %v173_v20, %v172_v13  ;;  %v447_v29 = vsel %vm373_vm6, %v443_v25, %v413_v16  ;;  %v3961_v30 = vsel %vm378_vm7, %v446_v26, %v420_v15  ;;  %v410_v33 = vrot.slane %v393_v23, 4  ;;  %1264 = vmatprep.subr.bf16.mxu0 %v3475_v63 }
 0x129   :  { %v3964_v32 = vsel %vm378_vm7, %v447_v29, %v421_v24  ;;  %v429_v34 = vsel %vm348_vm1, %v386_v57, %v388_v8  ;;  %v395_v36 = vrot.slane %v386_v57, 1  ;;  %v401_v37 = vrot.slane %v386_v57, 2 }
 0x12a   :  { %3361 = vmatmul.mubr.bf16.vlgmr.msra.gmra.mrb[0].mxu1 %v190_v28  ;;  %v433_v35 = vsel %vm353_vm2, %v429_v34, %v396_v27  ;;  %v428_v39 = vsel %vm348_vm1, %v384_v56, %v386_v57  ;;  %v415_v40 = vrot.slane %v393_v23, 5  ;;  %v414_v51 = vrot.slane %v392_v19, 5 }
 0x12b   :  { %v437_v38 = vsel %vm358_vm3, %v433_v35, %v3946_v62  ;;  %v432_v42 = vsel %vm353_vm2, %v428_v39, %v395_v36  ;;  %v422_v53 = vrot.slane %v392_v19, 6  ;;  %1265 = vmatpush1.bf16.msra.mxu0 %v3473_v1  ;;  %v3985_v7 = vsub.s32 3, %v3922_v43 }
 0x12c   :  { %v441_v41 = vsel %vm363_vm4, %v437_v38, %v406_v31  ;;  %v436_v49 = vsel %vm358_vm3, %v432_v42, %v401_v37  ;;  %1266 = vmatprep.subr.bf16.mxu0 %v3478_v3  ;;  %v286_v8 = vsub.s32 4, %v3922_v43  ;;  %v292_v10 = vsub.s32 5, %v3922_v43 }
 0x12d   :  { %v445_v47 = vsel %vm368_vm5, %v441_v41, %v410_v33  ;;  %v440_v52 = vsel %vm363_vm4, %v436_v49, %v405_v14  ;;  %v194_v9 = vrot.slane %v3927_v45, %v3985_v7 }
 0x12e   :  { %v3976_v50 = vsel %vm373_vm6, %v445_v47, %v415_v40  ;;  %v444_v54 = vsel %vm368_vm5, %v440_v52, %v406_v31  ;;  %v287_v11 = vrot.slane %v3927_v45, %v286_v8  ;;  %v293_v14 = vrot.slane %v3927_v45, %v292_v10 }
 0x12f   :  { %v448_v56 = vsel %vm373_vm6, %v444_v54, %v414_v51  ;;  %1267 = vmatpush1.bf16.msra.mxu0 %v3476_v2 }
 0x130   :  { %v3982_v57 = vsel %vm378_vm7, %v448_v56, %v422_v53  ;;  %1268 = vmatprep.subr.bf16.mxu0 %v3481_v4 }
 0x133   :  { %1269 = vmatpush1.bf16.msra.mxu0 %v3479_v5 }
 0x134   :  { %1279 = vmatprep.subr.bf16.mxu0 %v3484_v6 }
 0x1fd   :  { %v277_v12 = vpop.f32.mrb[0].mxu1 }
 0x1fe   :  { %v278_v13 = vadd.f32 %v277_v12, %v194_v9  ;;  %v3362_v15 = vpop.f32.mrb[1].mxu1 }
 0x1ff   :  { %v280_v16 = vpop.f32.mrb[2].mxu1 }
 0x200   :  { %v288_v17 = vmul.f32 %v287_v11, %v278_v13  ;;  %v281_v18 = vadd.f32 %v280_v16, %v194_v9  ;;  %v3363_v19 = vpop.f32.mrb[3].mxu1  ;;  %v4018_v16 = vrot.slane %v3848_v0, 6 }
 0x202   :  { %v294_v20 = vadd.f32 %v293_v14, %v288_v17  ;;  %v289_v21 = vmul.f32 %v287_v11, %v281_v18  ;;  %v3487_v18 = vld [vmem:[#allocation2 + $0x214] ss:$8 sps:$4 sm:$0xff]  }
 0x204   :  { %v296_v22 = vmax.f32 %v294_v20, 0.0  ;;  %v295_v23 = vadd.f32 %v293_v14, %v289_v21 }
 0x206   :  { %v299_v24 = vrot.slane %v296_v22, 1  ;;  %v303_v25 = vrot.slane %v296_v22, 3  ;;  %v349_v26 = vsel %vm348_vm1, 0.0, %v296_v22  ;;  %v297_v27 = vmax.f32 %v295_v23, 0.0 }
 0x207   :  { %v301_v28 = vrot.slane %v296_v22, 2 }
 0x208   :  { %v350_v29 = vsel %vm348_vm1, %v296_v22, %v299_v24  ;;  %v309_v31 = vrot.slane %v299_v24, 1  ;;  %v316_v33 = vrot.slane %v299_v24, 2  ;;  %v311_v34 = vrot.slane %v303_v25, 1 }
 0x209   :  { %v306_v35 = vrot.slane %v297_v27, 1  ;;  %v323_v36 = vrot.slane %v297_v27, 4  ;;  %v332_v37 = vrot.slane %v297_v27, 5  ;;  %v354_v39 = vsel %vm353_vm2, %v349_v26, %v299_v24 }
 0x20a   :  { %v355_v38 = vsel %vm353_vm2, %v350_v29, %v309_v31  ;;  %v307_v40 = vrot.slane %v297_v27, 2  ;;  %v308_v41 = vrot.slane %v297_v27, 3  ;;  %v340_v51 = vrot.slane %v297_v27, 6  ;;  %v3490_v29 = vld [vmem:[#allocation2 + $0x224] ss:$8 sps:$4 sm:$0xff]  }
 0x20b   :  { %v324_v42 = vrot.slane %v306_v35, 4  ;;  %v333_v47 = vrot.slane %v306_v35, 5  ;;  %v360_v49 = vsel %vm358_vm3, %v355_v38, %v316_v33  ;;  %v341_v52 = vrot.slane %v306_v35, 6  ;;  %v3493_v35 = vld [vmem:[#allocation2 + $0x234] ss:$8 sps:$4 sm:$0xff]  }
 0x20c   :  { %v365_v53 = vsel %vm363_vm4, %v360_v49, %v323_v36  ;;  %v359_v54 = vsel %vm358_vm3, %v354_v39, %v301_v28  ;;  %v325_v56 = vrot.slane %v307_v40, 4  ;;  %v330_v60 = vrot.slane %v308_v41, 4  ;;  %v3494_v38 = vld [vmem:[#allocation2 + $0x240] ss:$8 sps:$4 sm:$0xff]   ;;  %v3499_v39 = vld [vmem:[#allocation2 + $0x254] ss:$8 sps:$4 sm:$0xff]  }
 0x20d   :  { %v370_v58 = vsel %vm368_vm5, %v365_v53, %v324_v42  ;;  %v364_v59 = vsel %vm363_vm4, %v359_v54, %v3942_v55  ;;  %v352_v61 = vsel %vm348_vm1, %v301_v28, %v303_v25  ;;  %v310_v3 = vrot.slane %v301_v28, 1  ;;  %v3482_v55 = vld [vmem:[#allocation2 + $0x200] ss:$8 sps:$4 sm:$0xff]   ;;  %v3485_v25 = vld [vmem:[#allocation2 + $0x210] ss:$8 sps:$4 sm:$0xff]  }
 0x20e   :  { %v375_v63 = vsel %vm373_vm6, %v370_v58, %v333_v47  ;;  %v369_v1 = vsel %vm368_vm5, %v364_v59, %v323_v36  ;;  %v357_v2 = vsel %vm353_vm2, %v352_v61, %v311_v34  ;;  %v317_v9 = vrot.slane %v301_v28, 2  ;;  %v3488_v34 = vld [vmem:[#allocation2 + $0x220] ss:$8 sps:$4 sm:$0xff]   ;;  %v3491_v36 = vld [vmem:[#allocation2 + $0x230] ss:$8 sps:$4 sm:$0xff]  }
 0x20f   :  { %v380_v4 = vsel %vm378_vm7, %v375_v63, %v341_v52  ;;  %v374_v5 = vsel %vm373_vm6, %v369_v1, %v332_v37  ;;  %v362_v6 = vsel %vm358_vm3, %v357_v2, %v3946_v62  ;;  %v335_v13 = vrot.slane %v308_v41, 5  ;;  %v3496_v37 = vld [vmem:[#allocation2 + $0x244] ss:$8 sps:$4 sm:$0xff]   ;;  %v3505_v47 = vld [vmem:[#allocation2 + $0x274] ss:$8 sps:$4 sm:$0xff]  }
 0x210   :  { %v583_v11 = vpack.c.bf16 %v380_v4, %v380_v4  ;;  %v379_v12 = vsel %vm378_vm7, %v374_v5, %v340_v51  ;;  %v367_v14 = vsel %vm363_vm4, %v362_v6, %v325_v56  ;;  %v351_v19 = vsel %vm348_vm1, %v299_v24, %v301_v28  ;;  %v3502_v41 = vld [vmem:[#allocation2 + $0x264] ss:$8 sps:$4 sm:$0xff]   ;;  %v3503_v49 = vld [vmem:[#allocation2 + $0x270] ss:$8 sps:$4 sm:$0xff]   ;;  %v3506_v52 = vld [vmem:[#allocation2 + $0x280] ss:$8 sps:$4 sm:$0xff]  }
 0x211   :  { %v582_v15 = vpack.c.bf16 %v379_v12, %v379_v12  ;;  %v372_v17 = vsel %vm368_vm5, %v367_v14, %v330_v60  ;;  %v356_v20 = vsel %vm353_vm2, %v351_v19, %v310_v3  ;;  %v334_v26 = vrot.slane %v307_v40, 5  ;;  %v3508_v51 = vld [vmem:[#allocation2 + $0x284] ss:$8 sps:$4 sm:$0xff]   ;;  %v3511_v53 = vld [vmem:[#allocation2 + $0x294] ss:$8 sps:$4 sm:$0xff]  }
 0x212   :  { %1270 = vmatprep.mubr.bf16.mxu0 %v583_v11  ;;  %v377_v62 = vsel %vm373_vm6, %v372_v17, %v335_v13  ;;  %v361_v22 = vsel %vm358_vm3, %v356_v20, %v317_v9  ;;  %v342_v24 = vrot.slane %v307_v40, 6  ;;  %v3497_v40 = vld [vmem:[#allocation2 + $0x250] ss:$8 sps:$4 sm:$0xff]   ;;  %v3512_v58 = vld [vmem:[#allocation2 + $0x2a0] ss:$8 sps:$4 sm:$0xff]   ;;  %v587_v13 = vpack.c.bf16 %v3964_v32, %v3964_v32 }
 0x213   :  { %1271 = vmatmul.mubr.bf16.vlgmr.msra.gmra.mrb[4].mxu0 %v582_v15  ;;  %v382_v21 = vsel %vm378_vm7, %v377_v62, %v4018_v16  ;;  %v366_v27 = vsel %vm363_vm4, %v361_v22, %v324_v42  ;;  %v3500_v42 = vld [vmem:[#allocation2 + $0x260] ss:$8 sps:$4 sm:$0xff]   ;;  %v3509_v54 = vld [vmem:[#allocation2 + $0x290] ss:$8 sps:$4 sm:$0xff]   ;;  %v3517_v59 = vld [vmem:[#allocation2 + $0x2b4] ss:$8 sps:$4 sm:$0xff]  }
 0x214   :  { %1280 = vmatpush1.bf16.msra.mxu0 %v3482_v55  ;;  %v585_v23 = vpack.c.bf16 %v382_v21, %v382_v21  ;;  %v371_v28 = vsel %vm368_vm5, %v366_v27, %v325_v56  ;;  %v3514_v56 = vld [vmem:[#allocation2 + $0x2a4] ss:$8 sps:$4 sm:$0xff]   ;;  %v3515_v60 = vld [vmem:[#allocation2 + $0x2b0] ss:$8 sps:$4 sm:$0xff]   ;;  %v3518_v63 = vld [vmem:[#allocation2 + $0x2c0] ss:$8 sps:$4 sm:$0xff]  }
 0x215   :  { %1281 = vmatprep.subr.bf16.mxu0 %v3487_v18  ;;  %v376_v31 = vsel %vm373_vm6, %v371_v28, %v334_v26  ;;  %v3520_v61 = vld [vmem:[#allocation2 + $0x2c4] ss:$8 sps:$4 sm:$0xff]   ;;  %v3523_v1 = vld [vmem:[#allocation2 + $0x2d4] ss:$8 sps:$4 sm:$0xff]   ;;  %v3521_v2 = vld [vmem:[#allocation2 + $0x2d0] ss:$8 sps:$4 sm:$0xff]  }
 0x216   :  { %1311 = vmatprep.mubr.bf16.mxu0 %v585_v23  ;;  %v4031_v33 = vsel %vm378_vm7, %v376_v31, %v342_v24  ;;  %v3526_v3 = vld [vmem:[#allocation2 + $0x2e4] ss:$8 sps:$4 sm:$0xff]   ;;  %v3524_v4 = vld [vmem:[#allocation2 + $0x2e0] ss:$8 sps:$4 sm:$0xff]   ;;  %v3529_v5 = vld [vmem:[#allocation2 + $0x2f4] ss:$8 sps:$4 sm:$0xff]  }
 0x217   :  { %v3527_v6 = vld [vmem:[#allocation2 + $0x2f0] ss:$8 sps:$4 sm:$0xff]   ;;  %v3532_v9 = vld [vmem:[#allocation2 + $0x304] ss:$8 sps:$4 sm:$0xff]   ;;  %v3530_v11 = vld [vmem:[#allocation2 + $0x300] ss:$8 sps:$4 sm:$0xff]   ;;  %v584_v55 = vpack.c.bf16 %v4031_v33, %v4031_v33 }
 0x218   :  { %1282 = vmatpush1.bf16.msra.mxu0 %v3485_v25  ;;  %v3535_v12 = vld [vmem:[#allocation2 + $0x314] ss:$8 sps:$4 sm:$0xff]   ;;  %v3626_v14 = vld [vmem:[#allocation2 + $0x500] ss:$8 sps:$4 sm:$0xff]   ;;  %v3628_v15 = vld [vmem:[#allocation2 + $0x504] ss:$8 sps:$4 sm:$0xff]  }
 0x219   :  { %1283 = vmatprep.subr.bf16.mxu0 %v3490_v29  ;;  %v3533_v17 = vld [vmem:[#allocation2 + $0x310] ss:$8 sps:$4 sm:$0xff]   ;;  %v3631_v18 = vld [vmem:[#allocation2 + $0x514] ss:$8 sps:$4 sm:$0xff]   ;;  %v3538_v19 = vld [vmem:[#allocation2 + $0x324] ss:$8 sps:$4 sm:$0xff]   ;;  %1582 = vmatprep.subr.bf16.mxu1 %v3628_v15 }
 0x21a   :  { %1583 = vmatpush1.bf16.msra.mxu1 %v3626_v14  ;;  %v3629_v62 = vld [vmem:[#allocation2 + $0x510] ss:$8 sps:$4 sm:$0xff]   ;;  %v3634_v20 = vld [vmem:[#allocation2 + $0x524] ss:$8 sps:$4 sm:$0xff]   ;;  %v3536_v21 = vld [vmem:[#allocation2 + $0x320] ss:$8 sps:$4 sm:$0xff]  }
 0x21b   :  { %1584 = vmatprep.subr.bf16.mxu1 %v3631_v18  ;;  %v3541_v22 = vld [vmem:[#allocation2 + $0x334] ss:$8 sps:$4 sm:$0xff]   ;;  %v3632_v32 = vld [vmem:[#allocation2 + $0x520] ss:$8 sps:$4 sm:$0xff]   ;;  %v3539_v25 = vld [vmem:[#allocation2 + $0x330] ss:$8 sps:$4 sm:$0xff]  }
 0x21c   :  { %1284 = vmatpush1.bf16.msra.mxu0 %v3488_v34  ;;  %v3637_v23 = vld [vmem:[#allocation2 + $0x534] ss:$8 sps:$4 sm:$0xff]   ;;  %v3544_v26 = vld [vmem:[#allocation2 + $0x344] ss:$8 sps:$4 sm:$0xff]   ;;  %v3635_v27 = vld [vmem:[#allocation2 + $0x530] ss:$8 sps:$4 sm:$0xff]  }
 0x21d   :  { %1285 = vmatprep.subr.bf16.mxu0 %v3493_v35  ;;  %v3640_v29 = vld [vmem:[#allocation2 + $0x544] ss:$8 sps:$4 sm:$0xff]   ;;  %v3542_v24 = vld [vmem:[#allocation2 + $0x340] ss:$8 sps:$4 sm:$0xff]   ;;  %v3547_v28 = vld [vmem:[#allocation2 + $0x354] ss:$8 sps:$4 sm:$0xff]  }
 0x21e   :  { %1585 = vmatpush1.bf16.msra.mxu1 %v3629_v62  ;;  %v3638_v31 = vld [vmem:[#allocation2 + $0x540] ss:$8 sps:$4 sm:$0xff]   ;;  %v3643_v33 = vld [vmem:[#allocation2 + $0x554] ss:$8 sps:$4 sm:$0xff]   ;;  %v3545_v34 = vld [vmem:[#allocation2 + $0x350] ss:$8 sps:$4 sm:$0xff]  }
 0x21f   :  { %1586 = vmatprep.subr.bf16.mxu1 %v3634_v20  ;;  %v3550_v35 = vld [vmem:[#allocation2 + $0x364] ss:$8 sps:$4 sm:$0xff]   ;;  %v3583_v14 = vld [vmem:[#allocation2 + $0x414] ss:$8 sps:$4 sm:$0xff]   ;;  %v3590_v20 = vld [vmem:[#allocation2 + $0x440] ss:$8 sps:$4 sm:$0xff]  }
 0x220   :  { %1286 = vmatpush1.bf16.msra.mxu0 %v3491_v36  ;;  %v3641_v36 = vld [vmem:[#allocation2 + $0x550] ss:$8 sps:$4 sm:$0xff]   ;;  %v3586_v18 = vld [vmem:[#allocation2 + $0x424] ss:$8 sps:$4 sm:$0xff]   ;;  %v3589_v62 = vld [vmem:[#allocation2 + $0x434] ss:$8 sps:$4 sm:$0xff]  }
 0x221   :  { %1287 = vmatprep.subr.bf16.mxu0 %v3496_v37  ;;  %v3646_v37 = vld [vmem:[#allocation2 + $0x564] ss:$8 sps:$4 sm:$0xff]  }
 0x222   :  { %1587 = vmatpush1.bf16.msra.mxu1 %v3632_v32  ;;  %v3596_v32 = vld [vmem:[#allocation2 + $0x460] ss:$8 sps:$4 sm:$0xff]  }
 0x223   :  { %1588 = vmatprep.subr.bf16.mxu1 %v3637_v23  ;;  %v3601_v23 = vld [vmem:[#allocation2 + $0x474] ss:$8 sps:$4 sm:$0xff]  }
 0x224   :  { %1288 = vmatpush1.bf16.msra.mxu0 %v3494_v38  ;;  %v3548_v38 = vld [vmem:[#allocation2 + $0x360] ss:$8 sps:$4 sm:$0xff]  }
 0x225   :  { %1289 = vmatprep.subr.bf16.mxu0 %v3499_v39  ;;  %v3553_v39 = vld [vmem:[#allocation2 + $0x374] ss:$8 sps:$4 sm:$0xff]  }
 0x226   :  { %1589 = vmatpush1.bf16.msra.mxu1 %v3635_v27  ;;  %v3602_v27 = vld [vmem:[#allocation2 + $0x480] ss:$8 sps:$4 sm:$0xff]  }
 0x227   :  { %1590 = vmatprep.subr.bf16.mxu1 %v3640_v29  ;;  %v3607_v29 = vld [vmem:[#allocation2 + $0x494] ss:$8 sps:$4 sm:$0xff]  }
 0x228   :  { %1290 = vmatpush1.bf16.msra.mxu0 %v3497_v40  ;;  %v3644_v40 = vld [vmem:[#allocation2 + $0x560] ss:$8 sps:$4 sm:$0xff]  }
 0x229   :  { %1291 = vmatprep.subr.bf16.mxu0 %v3502_v41  ;;  %v3649_v41 = vld [vmem:[#allocation2 + $0x574] ss:$8 sps:$4 sm:$0xff]  }
 0x22a   :  { %1591 = vmatpush1.bf16.msra.mxu1 %v3638_v31  ;;  %v3608_v31 = vld [vmem:[#allocation2 + $0x4a0] ss:$8 sps:$4 sm:$0xff]  }
 0x22b   :  { %1592 = vmatprep.subr.bf16.mxu1 %v3643_v33  ;;  %v3613_v33 = vld [vmem:[#allocation2 + $0x4b4] ss:$8 sps:$4 sm:$0xff]  }
 0x22c   :  { %1292 = vmatpush1.bf16.msra.mxu0 %v3500_v42  ;;  %v3551_v42 = vld [vmem:[#allocation2 + $0x370] ss:$8 sps:$4 sm:$0xff]  }
 0x22d   :  { %1293 = vmatprep.subr.bf16.mxu0 %v3505_v47  ;;  %v3556_v47 = vld [vmem:[#allocation2 + $0x384] ss:$8 sps:$4 sm:$0xff]  }
 0x22e   :  { %1593 = vmatpush1.bf16.msra.mxu1 %v3641_v36  ;;  %v3614_v36 = vld [vmem:[#allocation2 + $0x4c0] ss:$8 sps:$4 sm:$0xff]  }
 0x22f   :  { %1594 = vmatprep.subr.bf16.mxu1 %v3646_v37  ;;  %v3619_v37 = vld [vmem:[#allocation2 + $0x4d4] ss:$8 sps:$4 sm:$0xff]  }
 0x230   :  { %1294 = vmatpush1.bf16.msra.mxu0 %v3503_v49  ;;  %v3647_v49 = vld [vmem:[#allocation2 + $0x570] ss:$8 sps:$4 sm:$0xff]  }
 0x231   :  { %1295 = vmatprep.subr.bf16.mxu0 %v3508_v51  ;;  %v3652_v51 = vld [vmem:[#allocation2 + $0x584] ss:$8 sps:$4 sm:$0xff]  }
 0x232   :  { %1595 = vmatpush1.bf16.msra.mxu1 %v3644_v40  ;;  %v3620_v40 = vld [vmem:[#allocation2 + $0x4e0] ss:$8 sps:$4 sm:$0xff]  }
 0x233   :  { %1596 = vmatprep.subr.bf16.mxu1 %v3649_v41  ;;  %v3625_v41 = vld [vmem:[#allocation2 + $0x4f4] ss:$8 sps:$4 sm:$0xff]  }
 0x234   :  { %1296 = vmatpush1.bf16.msra.mxu0 %v3506_v52  ;;  %v3554_v52 = vld [vmem:[#allocation2 + $0x380] ss:$8 sps:$4 sm:$0xff]  }
 0x235   :  { %1297 = vmatprep.subr.bf16.mxu0 %v3511_v53  ;;  %v3559_v53 = vld [vmem:[#allocation2 + $0x394] ss:$8 sps:$4 sm:$0xff]  }
 0x236   :  { %1597 = vmatpush1.bf16.msra.mxu1 %v3647_v49  ;;  %v3653_v49 = vld [vmem:[#allocation2 + $0x590] ss:$8 sps:$4 sm:$0xff]  }
 0x237   :  { %1598 = vmatprep.subr.bf16.mxu1 %v3652_v51  ;;  %v3655_v51 = vld [vmem:[#allocation2 + $0x594] ss:$8 sps:$4 sm:$0xff]  }
 0x238   :  { %1298 = vmatpush1.bf16.msra.mxu0 %v3509_v54  ;;  %v3650_v54 = vld [vmem:[#allocation2 + $0x580] ss:$8 sps:$4 sm:$0xff]  }
 0x239   :  { %1299 = vmatprep.subr.bf16.mxu0 %v3514_v56  ;;  %v3557_v56 = vld [vmem:[#allocation2 + $0x390] ss:$8 sps:$4 sm:$0xff]  }
 0x23a   :  { %1599 = vmatpush1.bf16.msra.mxu1 %v3650_v54  ;;  %v3661_v54 = vld [vmem:[#allocation2 + $0x5b4] ss:$8 sps:$4 sm:$0xff]  }
 0x23b   :  { %1600 = vmatprep.subr.bf16.mxu1 %v3655_v51 }
 0x23c   :  { %1300 = vmatpush1.bf16.msra.mxu0 %v3512_v58  ;;  %v3562_v58 = vld [vmem:[#allocation2 + $0x3a4] ss:$8 sps:$4 sm:$0xff]  }
 0x23d   :  { %1301 = vmatprep.subr.bf16.mxu0 %v3517_v59  ;;  %v3560_v59 = vld [vmem:[#allocation2 + $0x3a0] ss:$8 sps:$4 sm:$0xff]  }
 0x23e   :  { %1601 = vmatpush1.bf16.msra.mxu1 %v3653_v49 }
 0x240   :  { %1302 = vmatpush1.bf16.msra.mxu0 %v3515_v60  ;;  %v3565_v60 = vld [vmem:[#allocation2 + $0x3b4] ss:$8 sps:$4 sm:$0xff]  }
 0x241   :  { %1303 = vmatprep.subr.bf16.mxu0 %v3520_v61  ;;  %v3563_v61 = vld [vmem:[#allocation2 + $0x3b0] ss:$8 sps:$4 sm:$0xff]  }
 0x244   :  { %1304 = vmatpush1.bf16.msra.mxu0 %v3518_v63  ;;  %v3568_v63 = vld [vmem:[#allocation2 + $0x3c4] ss:$8 sps:$4 sm:$0xff]  }
 0x245   :  { %1305 = vmatprep.subr.bf16.mxu0 %v3523_v1  ;;  %v3566_v1 = vld [vmem:[#allocation2 + $0x3c0] ss:$8 sps:$4 sm:$0xff]  }
 0x248   :  { %1306 = vmatpush1.bf16.msra.mxu0 %v3521_v2  ;;  %v3571_v2 = vld [vmem:[#allocation2 + $0x3d4] ss:$8 sps:$4 sm:$0xff]  }
 0x249   :  { %1307 = vmatprep.subr.bf16.mxu0 %v3526_v3  ;;  %v3569_v3 = vld [vmem:[#allocation2 + $0x3d0] ss:$8 sps:$4 sm:$0xff]  }
 0x24c   :  { %1308 = vmatpush1.bf16.msra.mxu0 %v3524_v4  ;;  %v3574_v4 = vld [vmem:[#allocation2 + $0x3e4] ss:$8 sps:$4 sm:$0xff]  }
 0x24d   :  { %1309 = vmatprep.subr.bf16.mxu0 %v3529_v5  ;;  %v3572_v5 = vld [vmem:[#allocation2 + $0x3e0] ss:$8 sps:$4 sm:$0xff]  }
 0x250   :  { %1310 = vmatpush1.bf16.msra.mxu0 %v3527_v6  ;;  %v3577_v6 = vld [vmem:[#allocation2 + $0x3f4] ss:$8 sps:$4 sm:$0xff]  }
 0x251   :  { %1320 = vmatprep.subr.bf16.mxu0 %v3532_v9  ;;  %v3575_v9 = vld [vmem:[#allocation2 + $0x3f0] ss:$8 sps:$4 sm:$0xff]  }
 0x253   :  { %1312 = vmatmul.mubr.bf16.vlgmr.msra.gmra.mrb[4].mxu0 %v584_v55  ;;  %v453_v55 = vsel %vm378_vm7, %v3976_v50, %v4018_v16  ;;  %v3587_v50 = vld [vmem:[#allocation2 + $0x430] ss:$8 sps:$4 sm:$0xff]   ;;  %v3592_v16 = vld [vmem:[#allocation2 + $0x444] ss:$8 sps:$4 sm:$0xff]  }
 0x254   :  { %1321 = vmatpush1.bf16.msra.mxu0 %v3530_v11  ;;  %1352 = vmatprep.mubr.bf16.mxu0 %v587_v13  ;;  %v3580_v11 = vld [vmem:[#allocation2 + $0x404] ss:$8 sps:$4 sm:$0xff]   ;;  %v586_v13 = vpack.c.bf16 %v3961_v30, %v3961_v30  ;;  %v589_v15 = vpack.c.bf16 %v453_v55, %v453_v55  ;;  %v3595_v30 = vld [vmem:[#allocation2 + $0x454] ss:$8 sps:$4 sm:$0xff]  }
 0x255   :  { %1322 = vmatprep.subr.bf16.mxu0 %v3535_v12  ;;  %v3578_v12 = vld [vmem:[#allocation2 + $0x400] ss:$8 sps:$4 sm:$0xff]  }
 0x258   :  { %1323 = vmatpush1.bf16.msra.mxu0 %v3533_v17  ;;  %v3581_v17 = vld [vmem:[#allocation2 + $0x410] ss:$8 sps:$4 sm:$0xff]  }
 0x259   :  { %1324 = vmatprep.subr.bf16.mxu0 %v3538_v19  ;;  %v3584_v19 = vld [vmem:[#allocation2 + $0x420] ss:$8 sps:$4 sm:$0xff]  }
 0x25c   :  { %1325 = vmatpush1.bf16.msra.mxu0 %v3536_v21  ;;  %v3593_v21 = vld [vmem:[#allocation2 + $0x450] ss:$8 sps:$4 sm:$0xff]  }
 0x25d   :  { %1326 = vmatprep.subr.bf16.mxu0 %v3541_v22  ;;  %v3598_v22 = vld [vmem:[#allocation2 + $0x464] ss:$8 sps:$4 sm:$0xff]  }
 0x260   :  { %1327 = vmatpush1.bf16.msra.mxu0 %v3539_v25  ;;  %v3599_v25 = vld [vmem:[#allocation2 + $0x470] ss:$8 sps:$4 sm:$0xff]  }
 0x261   :  { %1328 = vmatprep.subr.bf16.mxu0 %v3544_v26  ;;  %v3604_v26 = vld [vmem:[#allocation2 + $0x484] ss:$8 sps:$4 sm:$0xff]  }
 0x264   :  { %1329 = vmatpush1.bf16.msra.mxu0 %v3542_v24  ;;  %v3605_v24 = vld [vmem:[#allocation2 + $0x490] ss:$8 sps:$4 sm:$0xff]  }
 0x265   :  { %1330 = vmatprep.subr.bf16.mxu0 %v3547_v28  ;;  %v3610_v28 = vld [vmem:[#allocation2 + $0x4a4] ss:$8 sps:$4 sm:$0xff]  }
 0x268   :  { %1331 = vmatpush1.bf16.msra.mxu0 %v3545_v34  ;;  %v3611_v34 = vld [vmem:[#allocation2 + $0x4b0] ss:$8 sps:$4 sm:$0xff]  }
 0x269   :  { %1332 = vmatprep.subr.bf16.mxu0 %v3550_v35  ;;  %v3616_v35 = vld [vmem:[#allocation2 + $0x4c4] ss:$8 sps:$4 sm:$0xff]  }
 0x26c   :  { %1333 = vmatpush1.bf16.msra.mxu0 %v3548_v38  ;;  %v3617_v38 = vld [vmem:[#allocation2 + $0x4d0] ss:$8 sps:$4 sm:$0xff]  }
 0x26d   :  { %1334 = vmatprep.subr.bf16.mxu0 %v3553_v39  ;;  %v3622_v39 = vld [vmem:[#allocation2 + $0x4e4] ss:$8 sps:$4 sm:$0xff]  }
 0x270   :  { %1335 = vmatpush1.bf16.msra.mxu0 %v3551_v42  ;;  %v3623_v42 = vld [vmem:[#allocation2 + $0x4f0] ss:$8 sps:$4 sm:$0xff]  }
 0x271   :  { %1336 = vmatprep.subr.bf16.mxu0 %v3556_v47  ;;  %v588_v47 = vpack.c.bf16 %v3982_v57, %v3982_v57 }
 0x274   :  { %1337 = vmatpush1.bf16.msra.mxu0 %v3554_v52  ;;  %v3658_v52 = vld [vmem:[#allocation2 + $0x5a4] ss:$8 sps:$4 sm:$0xff]  }
 0x275   :  { %1338 = vmatprep.subr.bf16.mxu0 %v3559_v53  ;;  %v3656_v53 = vld [vmem:[#allocation2 + $0x5a0] ss:$8 sps:$4 sm:$0xff]   ;;  %1602 = vmatprep.subr.bf16.mxu1 %v3658_v52 }
 0x276   :  { %1603 = vmatpush1.bf16.msra.mxu1 %v3656_v53 }
 0x277   :  { %1604 = vmatprep.subr.bf16.mxu1 %v3661_v54  ;;  %v3677_v54 = vld [vmem:[#allocation2 + $0x630] ss:$8 sps:$4 sm:$0xff]  }
 0x278   :  { %1339 = vmatpush1.bf16.msra.mxu0 %v3557_v56  ;;  %v3659_v56 = vld [vmem:[#allocation2 + $0x5b0] ss:$8 sps:$4 sm:$0xff]  }
 0x279   :  { %1340 = vmatprep.subr.bf16.mxu0 %v3562_v58  ;;  %v592_v58 = vsub.s32 6, %v3922_v43 }
 0x27a   :  { %1605 = vmatpush1.bf16.msra.mxu1 %v3659_v56 }
 0x27b   :  { %v593_v57 = vrot.slane %v3927_v45, %v592_v58 }
 0x27c   :  { %1341 = vmatpush1.bf16.msra.mxu0 %v3560_v59  ;;  %v45_v59 = vld [vmem:[#allocation5 + $0x8] sm:$0xff] }
 0x27d   :  { %1342 = vmatprep.subr.bf16.mxu0 %v3565_v60  ;;  %v1404_v60 = vsub.s32 7, %v3922_v43 }
 0x280   :  { %1343 = vmatpush1.bf16.msra.mxu0 %v3563_v61  ;;  %v597_v61 = vrot.slane %v45_v59, %v592_v58 }
 0x281   :  { %1344 = vmatprep.subr.bf16.mxu0 %v3568_v63  ;;  %v4047_v63 = vld [vmem:[#allocation5 + $0x10] sm:$0xff] }
 0x284   :  { %1345 = vmatpush1.bf16.msra.mxu0 %v3566_v1  ;;  %v1405_v1 = vrot.slane %v3927_v45, %v1404_v60 }
 0x285   :  { %1346 = vmatprep.subr.bf16.mxu0 %v3571_v2  ;;  %v4050_v2 = vld [vmem:[#allocation5 + $0x18] sm:$0xff] }
 0x286   :  { %v1640_v49 = vrot.slane %v4050_v2, %v3985_v7 }
 0x288   :  { %1347 = vmatpush1.bf16.msra.mxu0 %v3569_v3 }
 0x289   :  { %1348 = vmatprep.subr.bf16.mxu0 %v3574_v4  ;;  %v1409_v4 = vrot.slane %v45_v59, %v1404_v60 }
 0x28c   :  { %1349 = vmatpush1.bf16.msra.mxu0 %v3572_v5 }
 0x28d   :  { %1350 = vmatprep.subr.bf16.mxu0 %v3577_v6 }
 0x290   :  { %1351 = vmatpush1.bf16.msra.mxu0 %v3575_v9  ;;  %v1415_v9 = vrot.slane %v4047_v63, %v3925_v44 }
 0x291   :  { %1361 = vmatprep.subr.bf16.mxu0 %v3580_v11 }
 0x293   :  { %1353 = vmatmul.mubr.bf16.vlgmr.msra.gmra.mrb[4].mxu0 %v586_v13 }
 0x294   :  { %1362 = vmatpush1.bf16.msra.mxu0 %v3578_v12  ;;  %1393 = vmatprep.mubr.bf16.mxu0 %v589_v15  ;;  %v1419_v12 = vrot.slane %v4050_v2, %v3925_v44 }
 0x295   :  { %1363 = vmatprep.subr.bf16.mxu0 %v3583_v14 }
 0x298   :  { %1364 = vmatpush1.bf16.msra.mxu0 %v3581_v17 }
 0x299   :  { %1365 = vmatprep.subr.bf16.mxu0 %v3586_v18 }
 0x29c   :  { %1366 = vmatpush1.bf16.msra.mxu0 %v3584_v19 }
 0x29d   :  { %1367 = vmatprep.subr.bf16.mxu0 %v3589_v62 }
 0x2a0   :  { %1368 = vmatpush1.bf16.msra.mxu0 %v3587_v50 }
 0x2a1   :  { %1369 = vmatprep.subr.bf16.mxu0 %v3592_v16 }
 0x2a4   :  { %1370 = vmatpush1.bf16.msra.mxu0 %v3590_v20  ;;  %v3662_v20 = vld [vmem:[#allocation2 + $0x640] ss:$8 sps:$4 sm:$0xff]  }
 0x2a5   :  { %1371 = vmatprep.subr.bf16.mxu0 %v3595_v30  ;;  %v3663_v30 = vld [vmem:[#allocation2 + $0x5c0] ss:$8 sps:$4 sm:$0xff]   ;;  %3183 = vmatprep.subr.bf16.mxu1 %v3662_v20  ;;  %v3680_v20 = vld [vmem:[#allocation2 + $0x750] ss:$8 sps:$4 sm:$0xff]  }
 0x2a8   :  { %1372 = vmatpush1.bf16.msra.mxu0 %v3593_v21  ;;  %v3664_v21 = vld [vmem:[#allocation2 + $0x650] ss:$8 sps:$4 sm:$0xff]  }
 0x2a9   :  { %1373 = vmatprep.subr.bf16.mxu0 %v3598_v22  ;;  %v3665_v22 = vld [vmem:[#allocation2 + $0x5d0] ss:$8 sps:$4 sm:$0xff]  }
 0x2ac   :  { %1374 = vmatpush1.bf16.msra.mxu0 %v3596_v32  ;;  %v3666_v32 = vld [vmem:[#allocation2 + $0x660] ss:$8 sps:$4 sm:$0xff]  }
 0x2ad   :  { %1375 = vmatprep.subr.bf16.mxu0 %v3601_v23  ;;  %v3667_v23 = vld [vmem:[#allocation2 + $0x5e0] ss:$8 sps:$4 sm:$0xff]  }
 0x2b0   :  { %1376 = vmatpush1.bf16.msra.mxu0 %v3599_v25  ;;  %v3668_v25 = vld [vmem:[#allocation2 + $0x670] ss:$8 sps:$4 sm:$0xff]  }
 0x2b1   :  { %1377 = vmatprep.subr.bf16.mxu0 %v3604_v26  ;;  %v3669_v26 = vld [vmem:[#allocation2 + $0x5f0] ss:$8 sps:$4 sm:$0xff]  }
 0x2b4   :  { %1378 = vmatpush1.bf16.msra.mxu0 %v3602_v27  ;;  %v3670_v27 = vld [vmem:[#allocation2 + $0x680] ss:$8 sps:$4 sm:$0xff]  }
 0x2b5   :  { %1379 = vmatprep.subr.bf16.mxu0 %v3607_v29  ;;  %v3671_v29 = vld [vmem:[#allocation2 + $0x600] ss:$8 sps:$4 sm:$0xff]  }
 0x2b8   :  { %1380 = vmatpush1.bf16.msra.mxu0 %v3605_v24  ;;  %v3672_v24 = vld [vmem:[#allocation2 + $0x690] ss:$8 sps:$4 sm:$0xff]  }
 0x2b9   :  { %1381 = vmatprep.subr.bf16.mxu0 %v3610_v28  ;;  %v3673_v28 = vld [vmem:[#allocation2 + $0x610] ss:$8 sps:$4 sm:$0xff]  }
 0x2bc   :  { %1382 = vmatpush1.bf16.msra.mxu0 %v3608_v31  ;;  %v3674_v31 = vld [vmem:[#allocation2 + $0x6a0] ss:$8 sps:$4 sm:$0xff]  }
 0x2bd   :  { %1383 = vmatprep.subr.bf16.mxu0 %v3613_v33  ;;  %v3675_v33 = vld [vmem:[#allocation2 + $0x620] ss:$8 sps:$4 sm:$0xff]  }
 0x2c0   :  { %1384 = vmatpush1.bf16.msra.mxu0 %v3611_v34  ;;  %v1453_v34 = vrot.slane %v4047_v63, %v3930_v46 }
 0x2c1   :  { %1385 = vmatprep.subr.bf16.mxu0 %v3616_v35  ;;  %v1457_v35 = vrot.slane %v4050_v2, %v3930_v46 }
 0x2c4   :  { %1386 = vmatpush1.bf16.msra.mxu0 %v3614_v36  ;;  %v1626_v36 = vrot.slane %v4047_v63, %v3935_v48 }
 0x2c5   :  { %1387 = vmatprep.subr.bf16.mxu0 %v3619_v37 }
 0x2c8   :  { %1388 = vmatpush1.bf16.msra.mxu0 %v3617_v38  ;;  %v1630_v38 = vrot.slane %v4050_v2, %v3935_v48  ;;  %v3678_v48 = vld [vmem:[#allocation2 + $0x740] ss:$8 sps:$4 sm:$0xff]  }
 0x2c9   :  { %1389 = vmatprep.subr.bf16.mxu0 %v3622_v39 }
 0x2cc   :  { %1390 = vmatpush1.bf16.msra.mxu0 %v3620_v40  ;;  %v1636_v40 = vrot.slane %v4047_v63, %v3985_v7 }
 0x2cd   :  { %1391 = vmatprep.subr.bf16.mxu0 %v3625_v41 }
 0x2d0   :  { %1392 = vmatpush1.bf16.msra.mxu0 %v3623_v42  ;;  %v3676_v42 = vld [vmem:[#allocation2 + $0x6b0] ss:$8 sps:$4 sm:$0xff]  }
 0x2d3   :  { %1394 = vmatmul.mubr.bf16.vlgmr.msra.gmra.mrb[4].mxu0 %v588_v47 }
 0x3a6   :  { %v1395_v3 = vpop.f32.mrb[4].mxu0 }
 0x3a7   :  { %v4052_v5 = vadd.f32 %v1395_v3, %v593_v57  ;;  %v1397_v6 = vpop.f32.mrb[5].mxu0 }
 0x3a8   :  { %v4056_v11 = vadd.f32 %v1397_v6, %v597_v61  ;;  %v1399_v55 = vpop.f32.mrb[6].mxu0 }
 0x3a9   :  { %v1400_v13 = vpop.f32.mrb[7].mxu0  ;;  %v1410_v14 = vmul.f32 %v4052_v5, %v1405_v1  ;;  %v1705_v45 = vrot.slane %v4052_v5, 3 }
 0x3aa   :  { %v1411_v15 = vmul.f32 %v4056_v11, %v1409_v4  ;;  %v1692_v4 = vrot.slane %v4052_v5, 1  ;;  %v1706_v6 = vrot.slane %v4056_v11, 3 }
 0x3ab   :  { %v1420_v17 = vadd.f32 %v1415_v9, %v1410_v14  ;;  %v4067_v18 = vsel %vm348_vm1, %v4052_v5, %v1705_v45  ;;  %v1693_v9 = vrot.slane %v4056_v11, 1 }
 0x3ac   :  { %v1421_v19 = vadd.f32 %v1419_v12, %v1411_v15  ;;  %v3413_v55 = vpack.i.bf16 %v1706_v6, %v1705_v45  ;;  %v3681_v45 = vld [vmem:[#allocation2 + $0x6d0] ss:$8 sps:$4 sm:$0xff]  }
 0x3ad   :  { %v1422_v62 = vmax.f32 %v1420_v17, 0.0 }
 0x3ae   :  { %v1423_v50 = vmax.f32 %v1421_v19, 0.0 }
 0x3af   :  { %v1448_v44 = vpack.c.bf16 %v1422_v62, %v1422_v62 }
 0x3b0   :  { %v1449_v16 = vpack.c.bf16 %v1423_v50, %v1423_v50 }
 0x3b2   :  { %3059 = vmatprep.mubr.msk.bf16.mxu1 %vm1578_vm8, %v1449_v16  ;;  %v3679_v16 = vld [vmem:[#allocation2 + $0x6c0] ss:$8 sps:$4 sm:$0xff]  }
 0x3b3   :  { %1615 = vmatmul.mubr.bf16.vlgmr.msra.gmra.mrb[4].mxu1 %v1448_v44 }
 0x3b4   :  { %3184 = vmatpush3.bf16.msra.mxu1 %v3663_v30 }
 0x3b5   :  { %3185 = vmatprep.subr.bf16.mxu1 %v3664_v21  ;;  %v3682_v21 = vld [vmem:[#allocation2 + $0x760] ss:$8 sps:$4 sm:$0xff]  }
 0x3b8   :  { %3186 = vmatpush3.bf16.msra.mxu1 %v3665_v22  ;;  %v3683_v22 = vld [vmem:[#allocation2 + $0x6e0] ss:$8 sps:$4 sm:$0xff]  }
 0x3b9   :  { %3187 = vmatprep.subr.bf16.mxu1 %v3666_v32  ;;  %v3684_v32 = vld [vmem:[#allocation2 + $0x770] ss:$8 sps:$4 sm:$0xff]  }
 0x3bc   :  { %3188 = vmatpush3.bf16.msra.mxu1 %v3667_v23  ;;  %v3685_v23 = vld [vmem:[#allocation2 + $0x6f0] ss:$8 sps:$4 sm:$0xff]  }
 0x3bd   :  { %3189 = vmatprep.subr.bf16.mxu1 %v3668_v25  ;;  %v3686_v25 = vld [vmem:[#allocation2 + $0x780] ss:$8 sps:$4 sm:$0xff]  }
 0x3c0   :  { %3190 = vmatpush3.bf16.msra.mxu1 %v3669_v26  ;;  %v3687_v26 = vld [vmem:[#allocation2 + $0x700] ss:$8 sps:$4 sm:$0xff]  }
 0x3c1   :  { %3191 = vmatprep.subr.bf16.mxu1 %v3670_v27 }
 0x3c4   :  { %3192 = vmatpush3.bf16.msra.mxu1 %v3671_v29  ;;  %v3688_v29 = vld [vmem:[#allocation2 + $0x790] ss:$8 sps:$4 sm:$0xff]  }
 0x3c5   :  { %3193 = vmatprep.subr.bf16.mxu1 %v3672_v24 }
 0x3c8   :  { %3194 = vmatpush3.bf16.msra.mxu1 %v3673_v28 }
 0x3c9   :  { %3195 = vmatprep.subr.bf16.mxu1 %v3674_v31 }
 0x3cc   :  { %3196 = vmatpush3.bf16.msra.mxu1 %v3675_v33  ;;  %v3689_v33 = vld [vmem:[#allocation2 + $0x710] ss:$8 sps:$4 sm:$0xff]  }
 0x3cd   :  { %3197 = vmatprep.subr.bf16.mxu1 %v3676_v42  ;;  %v3694_v42 = vld [vmem:[#allocation2 + $0x840] ss:$8 sps:$4 sm:$0xff]  }
 0x3d0   :  { %3198 = vmatpush3.bf16.msra.mxu1 %v3677_v54  ;;  %v3697_v54 = vld [vmem:[#allocation2 + $0x7d0] ss:$8 sps:$4 sm:$0xff]  }
 0x3d1   :  { %3205 = vmatprep.subr.bf16.mxu1 %v3678_v48  ;;  %v3700_v48 = vld [vmem:[#allocation2 + $0x870] ss:$8 sps:$4 sm:$0xff]  }
 0x486   :  { %v1616_v37 = vpop.f32.mrb[4].mxu1 }
 0x487   :  { %v1617_v39 = vadd.f32 %v1616_v37, %v1453_v34  ;;  %v1618_v41 = vpop.f32.mrb[5].mxu1  ;;  %v3690_v34 = vld [vmem:[#allocation2 + $0x7a0] ss:$8 sps:$4 sm:$0xff]  }
 0x488   :  { %v1619_v47 = vadd.f32 %v1618_v41, %v1457_v35  ;;  %v1620_v51 = vpop.f32.mrb[6].mxu1  ;;  %v3691_v37 = vld [vmem:[#allocation2 + $0x720] ss:$8 sps:$4 sm:$0xff]   ;;  %v3693_v41 = vld [vmem:[#allocation2 + $0x730] ss:$8 sps:$4 sm:$0xff]  }
 0x489   :  { %v1631_v52 = vmul.f32 %v1626_v36, %v1617_v39  ;;  %v1621_v46 = vpop.f32.mrb[7].mxu1  ;;  %v3695_v51 = vld [vmem:[#allocation2 + $0x7c0] ss:$8 sps:$4 sm:$0xff]  }
 0x48a   :  { %v1632_v53 = vmul.f32 %v1630_v38, %v1619_v47  ;;  %v3692_v38 = vld [vmem:[#allocation2 + $0x7b0] ss:$8 sps:$4 sm:$0xff]  }
 0x48b   :  { %v1641_v56 = vadd.f32 %v1636_v40, %v1631_v52  ;;  %v3696_v46 = vld [vmem:[#allocation2 + $0x850] ss:$8 sps:$4 sm:$0xff]  }
 0x48c   :  { %v1642_v58 = vadd.f32 %v1640_v49, %v1632_v53 }
 0x48d   :  { %v1643_v59 = vmax.f32 %v1641_v56, 0.0  ;;  %v3698_v56 = vld [vmem:[#allocation2 + $0x860] ss:$8 sps:$4 sm:$0xff]  }
 0x48e   :  { %v4082_v60 = vmax.f32 %v1642_v58, 0.0  ;;  %v3699_v58 = vld [vmem:[#allocation2 + $0x7e0] ss:$8 sps:$4 sm:$0xff]  }
 0x48f   :  { %v1647_v57 = vrot.slane %v1643_v59, 1  ;;  %v1660_v61 = vrot.slane %v1643_v59, 3  ;;  %v1656_v12 = vrot.slane %v1643_v59, 2 }
 0x490   :  { %v1661_v1 = vrot.slane %v4082_v60, 3  ;;  %v1648_v3 = vrot.slane %v4082_v60, 1 }
 0x491   :  { %1649 = vrot.lane.b32.xlu0 %v1647_v57, %s3850_s0  ;;  %v1684_v7 = vsel %vm348_vm1, %v1643_v59, %v1660_v61  ;;  %v1675_v14 = vrot.slane %v1656_v12, 3  ;;  %v3701_v59 = vld [vmem:[#allocation2 + $0x7f0] ss:$8 sps:$4 sm:$0xff]   ;;  %v3702_v57 = vld [vmem:[#allocation2 + $0x880] ss:$8 sps:$4 sm:$0xff]  }
 0x492   :  { %v3408_v2 = vpack.i.bf16 %v1661_v1, %v1660_v61  ;;  %v1927_v44 = vpack.c.bf16 %v1684_v7, %v1684_v7  ;;  %v3703_v61 = vld [vmem:[#allocation2 + $0x800] ss:$8 sps:$4 sm:$0xff]   ;;  %v3704_v1 = vld [vmem:[#allocation2 + $0x890] ss:$8 sps:$4 sm:$0xff]  }
 0x493   :  { %v1687_v62 = vsel %vm348_vm1, %v1656_v12, %v1675_v14  ;;  %v3705_v7 = vld [vmem:[#allocation2 + $0x810] ss:$8 sps:$4 sm:$0xff]  }
 0x494   :  { %3409 = vrot.lane.b32.xlu1 %v3408_v2, %s3850_s0  ;;  %v1930_v30 = vpack.c.bf16 %v1687_v62, %v1687_v62  ;;  %v1657_v2 = vrot.slane %v4082_v60, 2  ;;  %v3708_v12 = vld [vmem:[#allocation2 + $0x8b0] ss:$8 sps:$4 sm:$0xff]   ;;  %v3711_v62 = vld [vmem:[#allocation2 + $0x8c0] ss:$8 sps:$4 sm:$0xff]  }
 0x495   :  { %1651 = vrot.lane.b32.xlu0 %v1648_v3, %s3850_s0 }
 0x498   :  { %1694 = vrot.lane.b32.xlu1 %v1692_v4, %s3850_s0  ;;  %v3706_v4 = vld [vmem:[#allocation2 + $0x8a0] ss:$8 sps:$4 sm:$0xff]  }
 0x499   :  { %1696 = vrot.lane.b32.xlu0 %v1693_v9, %s3850_s0 }
 0x49c   :  { %3414 = vrot.lane.b32.xlu1 %v3413_v55, %s3850_s0  ;;  %v3707_v55 = vld [vmem:[#allocation2 + $0x820] ss:$8 sps:$4 sm:$0xff]  }
 0x503   :  { %v1650_v13 = vpop.permute.xlu0 %1649 }
 0x504   :  { %v1669_v15 = vsel %vm1578_vm8, %v4082_v60, %v1650_v13  ;;  %v3710_v60 = vld [vmem:[#allocation2 + $0x940] ss:$8 sps:$4 sm:$0xff]  }
 0x505   :  { %v1673_v17 = vrot.slane %v1669_v15, 3 }
 0x506   :  { %v3410_v27 = vpop.permute.xlu1 %3409 }
 0x507   :  { %v1685_v19 = vsel %vm348_vm1, %v1669_v15, %v1673_v17  ;;  %v3412_v24 = vunpack.i.h.bf16 %v3410_v27  ;;  %v3411_v28 = vunpack.i.l.bf16 %v3410_v27  ;;  %v1652_v31 = vpop.permute.xlu0 %1651  ;;  %v3709_v15 = vld [vmem:[#allocation2 + $0x830] ss:$8 sps:$4 sm:$0xff]   ;;  %v3722_v27 = vld [vmem:[#allocation2 + $0x9a0] ss:$8 sps:$4 sm:$0xff]  }
 0x508   :  { %v1928_v50 = vpack.c.bf16 %v1685_v19, %v1685_v19  ;;  %v1653_v35 = vsel %vm1578_vm8, %v1650_v13, %v1652_v31 }
 0x509   :  { %v1666_v36 = vsel %vm1578_vm8, %v3411_v28, %v3412_v24  ;;  %v1674_v39 = vrot.slane %v1653_v35, 3  ;;  %v1670_v6 = vsel %vm1578_vm8, %v1657_v2, %v3411_v28  ;;  %v3723_v24 = vld [vmem:[#allocation2 + $0x920] ss:$8 sps:$4 sm:$0xff]   ;;  %v3724_v28 = vld [vmem:[#allocation2 + $0x9b0] ss:$8 sps:$4 sm:$0xff]  }
 0x50a   :  { %2551 = vmatprep.mubr.bf16.mxu1 %v1928_v50  ;;  %v1677_v40 = vrot.slane %v1666_v36, 3  ;;  %v4101_v3 = vpop.permute.xlu1 %1694  ;;  %v1676_v13 = vrot.slane %v1670_v6, 3  ;;  %v3741_v2 = vld [vmem:[#allocation2 + $0xa30] ss:$8 sps:$4 sm:$0xff]  }
 0x50b   :  { %2552 = vmatmul.mubr.bf16.vlgmr.msra.gmra.mrb[8].mxu1 %v1927_v44  ;;  %v1686_v47 = vsel %vm348_vm1, %v1653_v35, %v1674_v39  ;;  %v1714_v9 = vsel %vm1578_vm8, %v4056_v11, %v4101_v3 }
 0x50c   :  { %3206 = vmatpush3.bf16.msra.mxu1 %v3679_v16  ;;  %2591 = vmatprep.mubr.bf16.mxu1 %v1930_v30  ;;  %v1689_v49 = vsel %vm348_vm1, %v1666_v36, %v1677_v40  ;;  %v1929_v52 = vpack.c.bf16 %v1686_v47, %v1686_v47  ;;  %v1718_v14 = vrot.slane %v1714_v9, 3  ;;  %v1688_v17 = vsel %vm348_vm1, %v1670_v6, %v1676_v13  ;;  %v3712_v16 = vld [vmem:[#allocation2 + $0x950] ss:$8 sps:$4 sm:$0xff]   ;;  %v3714_v30 = vld [vmem:[#allocation2 + $0x960] ss:$8 sps:$4 sm:$0xff]  }
 0x50d   :  { %3207 = vmatprep.subr.bf16.mxu1 %v3680_v20  ;;  %v1932_v53 = vpack.c.bf16 %v1689_v49, %v1689_v49  ;;  %v1931_v50 = vpack.c.bf16 %v1688_v17, %v1688_v17  ;;  %v3713_v20 = vld [vmem:[#allocation2 + $0x8d0] ss:$8 sps:$4 sm:$0xff]   ;;  %v3727_v36 = vld [vmem:[#allocation2 + $0x9c0] ss:$8 sps:$4 sm:$0xff]  }
 0x50e   :  { %v1730_v19 = vsel %vm348_vm1, %v1714_v9, %v1718_v14  ;;  %v3730_v40 = vld [vmem:[#allocation2 + $0xa60] ss:$8 sps:$4 sm:$0xff]   ;;  %v3733_v47 = vld [vmem:[#allocation2 + $0x9f0] ss:$8 sps:$4 sm:$0xff]  }
 0x50f   :  { %v1934_v44 = vpack.c.bf16 %v1730_v19, %v1730_v19  ;;  %v3734_v49 = vld [vmem:[#allocation2 + $0xa80] ss:$8 sps:$4 sm:$0xff]   ;;  %v3745_v14 = vld [vmem:[#allocation2 + $0xad0] ss:$8 sps:$4 sm:$0xff]  }
 0x510   :  { %3208 = vmatpush3.bf16.msra.mxu1 %v3681_v45  ;;  %v3715_v45 = vld [vmem:[#allocation2 + $0x8e0] ss:$8 sps:$4 sm:$0xff]   ;;  %v3748_v17 = vld [vmem:[#allocation2 + $0xb70] ss:$8 sps:$4 sm:$0xff]  }
 0x511   :  { %3209 = vmatprep.subr.bf16.mxu1 %v3682_v21  ;;  %v3716_v21 = vld [vmem:[#allocation2 + $0x970] ss:$8 sps:$4 sm:$0xff]  }
 0x512   :  { %v3749_v19 = vld [vmem:[#allocation2 + $0xaf0] ss:$8 sps:$4 sm:$0xff]  }
 0x514   :  { %3210 = vmatpush3.bf16.msra.mxu1 %v3683_v22  ;;  %v3717_v22 = vld [vmem:[#allocation2 + $0x8f0] ss:$8 sps:$4 sm:$0xff]  }
 0x515   :  { %3211 = vmatprep.subr.bf16.mxu1 %v3684_v32  ;;  %v3718_v32 = vld [vmem:[#allocation2 + $0x980] ss:$8 sps:$4 sm:$0xff]  }
 0x518   :  { %3212 = vmatpush3.bf16.msra.mxu1 %v3685_v23  ;;  %v3719_v23 = vld [vmem:[#allocation2 + $0x900] ss:$8 sps:$4 sm:$0xff]  }
 0x519   :  { %3213 = vmatprep.subr.bf16.mxu1 %v3686_v25  ;;  %v3720_v25 = vld [vmem:[#allocation2 + $0x990] ss:$8 sps:$4 sm:$0xff]  }
 0x51c   :  { %3214 = vmatpush3.bf16.msra.mxu1 %v3687_v26  ;;  %v3721_v26 = vld [vmem:[#allocation2 + $0x910] ss:$8 sps:$4 sm:$0xff]  }
 0x51d   :  { %3215 = vmatprep.subr.bf16.mxu1 %v3688_v29  ;;  %v1701_v29 = vrot.slane %v4052_v5, 2  ;;  %v3729_v5 = vld [vmem:[#allocation2 + $0x9d0] ss:$8 sps:$4 sm:$0xff]  }
 0x51f   :  { %v1720_v31 = vrot.slane %v1701_v29, 3 }
 0x520   :  { %3216 = vmatpush3.bf16.msra.mxu1 %v3689_v33  ;;  %v3725_v33 = vld [vmem:[#allocation2 + $0x930] ss:$8 sps:$4 sm:$0xff]  }
 0x521   :  { %3217 = vmatprep.subr.bf16.mxu1 %v3690_v34  ;;  %v3726_v34 = vld [vmem:[#allocation2 + $0xa40] ss:$8 sps:$4 sm:$0xff]   ;;  %v1732_v35 = vsel %vm348_vm1, %v1701_v29, %v1720_v31 }
 0x522   :  { %v1936_v39 = vpack.c.bf16 %v1732_v35, %v1732_v35  ;;  %v3758_v31 = vld [vmem:[#allocation2 + $0xbc0] ss:$8 sps:$4 sm:$0xff]   ;;  %v3761_v35 = vld [vmem:[#allocation2 + $0xbf0] ss:$8 sps:$4 sm:$0xff]  }
 0x524   :  { %3218 = vmatpush3.bf16.msra.mxu1 %v3691_v37  ;;  %v1933_v37 = vpack.c.bf16 %v4067_v18, %v4067_v18  ;;  %v3415_v18 = vpop.permute.xlu1 %3414 }
 0x525   :  { %3219 = vmatprep.subr.bf16.mxu1 %v3692_v38  ;;  %v3728_v38 = vld [vmem:[#allocation2 + $0xa50] ss:$8 sps:$4 sm:$0xff]  }
 0x528   :  { %3220 = vmatpush3.bf16.msra.mxu1 %v3693_v41  ;;  %v3731_v41 = vld [vmem:[#allocation2 + $0x9e0] ss:$8 sps:$4 sm:$0xff]  }
 0x529   :  { %3227 = vmatprep.subr.bf16.mxu1 %v3694_v42  ;;  %v3732_v42 = vld [vmem:[#allocation2 + $0xa70] ss:$8 sps:$4 sm:$0xff]  }
 0x52b   :  { %2592 = vmatmul.mubr.bf16.vlgmr.msra.gmra.mrb[12].mxu1 %v1929_v52  ;;  %v3736_v52 = vld [vmem:[#allocation2 + $0xa90] ss:$8 sps:$4 sm:$0xff]  }
 0x52c   :  { %3228 = vmatpush3.bf16.msra.mxu1 %v3695_v51  ;;  %2631 = vmatprep.mubr.bf16.mxu1 %v1932_v53  ;;  %v3735_v51 = vld [vmem:[#allocation2 + $0xa00] ss:$8 sps:$4 sm:$0xff]   ;;  %v3417_v53 = vunpack.i.h.bf16 %v3415_v18 }
 0x52d   :  { %3229 = vmatprep.subr.bf16.mxu1 %v3696_v46  ;;  %v1697_v46 = vpop.permute.xlu0 %1696 }
 0x530   :  { %3230 = vmatpush3.bf16.msra.mxu1 %v3697_v54  ;;  %v3416_v54 = vunpack.i.l.bf16 %v3415_v18  ;;  %v3765_v18 = vld [vmem:[#allocation2 + $0xc30] ss:$8 sps:$4 sm:$0xff]  }
 0x531   :  { %3231 = vmatprep.subr.bf16.mxu1 %v3698_v56  ;;  %v3737_v56 = vld [vmem:[#allocation2 + $0xa10] ss:$8 sps:$4 sm:$0xff]  }
 0x534   :  { %3232 = vmatpush3.bf16.msra.mxu1 %v3699_v58  ;;  %v3738_v58 = vld [vmem:[#allocation2 + $0xaa0] ss:$8 sps:$4 sm:$0xff]  }
 0x535   :  { %3233 = vmatprep.subr.bf16.mxu1 %v3700_v48  ;;  %v1698_v48 = vsel %vm1578_vm8, %v4101_v3, %v1697_v46  ;;  %v3744_v3 = vld [vmem:[#allocation2 + $0xb50] ss:$8 sps:$4 sm:$0xff]  }
 0x538   :  { %3234 = vmatpush3.bf16.msra.mxu1 %v3701_v59  ;;  %v1711_v59 = vsel %vm1578_vm8, %v3416_v54, %v3417_v53 }
 0x539   :  { %3235 = vmatprep.subr.bf16.mxu1 %v3702_v57  ;;  %v3739_v57 = vld [vmem:[#allocation2 + $0xa20] ss:$8 sps:$4 sm:$0xff]  }
 0x53c   :  { %3236 = vmatpush3.bf16.msra.mxu1 %v3703_v61  ;;  %v3740_v61 = vld [vmem:[#allocation2 + $0xab0] ss:$8 sps:$4 sm:$0xff]  }
 0x53d   :  { %3237 = vmatprep.subr.bf16.mxu1 %v3704_v1  ;;  %v1719_v1 = vrot.slane %v1698_v48, 3 }
 0x53f   :  { %v1731_v6 = vsel %vm348_vm1, %v1698_v48, %v1719_v1 }
 0x540   :  { %3238 = vmatpush3.bf16.msra.mxu1 %v3705_v7  ;;  %v1722_v7 = vrot.slane %v1711_v59, 3 }
 0x541   :  { %3239 = vmatprep.subr.bf16.mxu1 %v3706_v4  ;;  %v3742_v4 = vld [vmem:[#allocation2 + $0xb40] ss:$8 sps:$4 sm:$0xff]  }
 0x542   :  { %v1734_v9 = vsel %vm348_vm1, %v1711_v59, %v1722_v7 }
 0x543   :  { %v1938_v13 = vpack.c.bf16 %v1734_v9, %v1734_v9 }
 0x544   :  { %3240 = vmatpush3.bf16.msra.mxu1 %v3707_v55  ;;  %v3743_v55 = vld [vmem:[#allocation2 + $0xac0] ss:$8 sps:$4 sm:$0xff]  }
 0x545   :  { %3241 = vmatprep.subr.bf16.mxu1 %v3708_v12  ;;  %v1935_v12 = vpack.c.bf16 %v1731_v6, %v1731_v6 }
 0x548   :  { %3242 = vmatpush3.bf16.msra.mxu1 %v3709_v15  ;;  %v3746_v15 = vld [vmem:[#allocation2 + $0xb60] ss:$8 sps:$4 sm:$0xff]  }
 0x549   :  { %3249 = vmatprep.subr.bf16.mxu1 %v3710_v60  ;;  %v3747_v60 = vld [vmem:[#allocation2 + $0xae0] ss:$8 sps:$4 sm:$0xff]  }
 0x54b   :  { %2632 = vmatmul.mubr.bf16.vlgmr.msra.gmra.mrb[16].mxu1 %v1931_v50  ;;  %v3751_v50 = vld [vmem:[#allocation2 + $0xb00] ss:$8 sps:$4 sm:$0xff]  }
 0x54c   :  { %3250 = vmatpush3.bf16.msra.mxu1 %v3711_v62  ;;  %2671 = vmatprep.mubr.bf16.mxu1 %v1934_v44  ;;  %v3750_v62 = vld [vmem:[#allocation2 + $0xb80] ss:$8 sps:$4 sm:$0xff]   ;;  %v3753_v44 = vld [vmem:[#allocation2 + $0xb10] ss:$8 sps:$4 sm:$0xff]  }
 0x54d   :  { %3251 = vmatprep.subr.bf16.mxu1 %v3712_v16  ;;  %v3752_v16 = vld [vmem:[#allocation2 + $0xb90] ss:$8 sps:$4 sm:$0xff]  }
 0x550   :  { %3252 = vmatpush3.bf16.msra.mxu1 %v3713_v20  ;;  %v1702_v20 = vrot.slane %v4056_v11, 2 }
 0x551   :  { %3253 = vmatprep.subr.bf16.mxu1 %v3714_v30  ;;  %v3754_v30 = vld [vmem:[#allocation2 + $0xba0] ss:$8 sps:$4 sm:$0xff]  }
 0x554   :  { %3254 = vmatpush3.bf16.msra.mxu1 %v3715_v45  ;;  %v1715_v45 = vsel %vm1578_vm8, %v1702_v20, %v3416_v54 }
 0x555   :  { %3255 = vmatprep.subr.bf16.mxu1 %v3716_v21  ;;  %v3755_v21 = vld [vmem:[#allocation2 + $0xb20] ss:$8 sps:$4 sm:$0xff]  }
 0x558   :  { %3256 = vmatpush3.bf16.msra.mxu1 %v3717_v22  ;;  %v3756_v22 = vld [vmem:[#allocation2 + $0xbb0] ss:$8 sps:$4 sm:$0xff]  }
 0x559   :  { %3257 = vmatprep.subr.bf16.mxu1 %v3718_v32  ;;  %v1721_v32 = vrot.slane %v1715_v45, 3 }
 0x55c   :  { %3258 = vmatpush3.bf16.msra.mxu1 %v3719_v23  ;;  %v3757_v23 = vld [vmem:[#allocation2 + $0xb30] ss:$8 sps:$4 sm:$0xff]  }
 0x55d   :  { %3259 = vmatprep.subr.bf16.mxu1 %v3720_v25  ;;  %v1733_v25 = vsel %vm348_vm1, %v1715_v45, %v1721_v32 }
 0x560   :  { %3260 = vmatpush3.bf16.msra.mxu1 %v3721_v26  ;;  %v1937_v26 = vpack.c.bf16 %v1733_v25, %v1733_v25 }
 0x561   :  { %3261 = vmatprep.subr.bf16.mxu1 %v3722_v27 }
 0x564   :  { %3262 = vmatpush3.bf16.msra.mxu1 %v3723_v24 }
 0x565   :  { %3263 = vmatprep.subr.bf16.mxu1 %v3724_v28 }
 0x568   :  { %3264 = vmatpush3.bf16.msra.mxu1 %v3725_v33  ;;  %v3759_v33 = vld [vmem:[#allocation2 + $0xbd0] ss:$8 sps:$4 sm:$0xff]  }
 0x569   :  { %3271 = vmatprep.subr.bf16.mxu1 %v3726_v34  ;;  %v3760_v34 = vld [vmem:[#allocation2 + $0xbe0] ss:$8 sps:$4 sm:$0xff]  }
 0x56b   :  { %2672 = vmatmul.mubr.bf16.vlgmr.msra.gmra.mrb[20].mxu1 %v1933_v37  ;;  %v3763_v37 = vld [vmem:[#allocation2 + $0xc10] ss:$8 sps:$4 sm:$0xff]  }
 0x56c   :  { %3272 = vmatpush3.bf16.msra.mxu1 %v3727_v36  ;;  %2711 = vmatprep.mubr.bf16.mxu1 %v1936_v39  ;;  %v3762_v36 = vld [vmem:[#allocation2 + $0xc00] ss:$8 sps:$4 sm:$0xff]  }
 0x56d   :  { %3273 = vmatprep.subr.bf16.mxu1 %v3728_v38  ;;  %v1942_v38 = vrot.slane %v4047_v63, %v286_v8 }
 0x570   :  { %3274 = vmatpush3.bf16.msra.mxu1 %v3729_v5 }
 0x571   :  { %3275 = vmatprep.subr.bf16.mxu1 %v3730_v40 }
 0x574   :  { %3276 = vmatpush3.bf16.msra.mxu1 %v3731_v41 }
 0x575   :  { %3277 = vmatprep.subr.bf16.mxu1 %v3732_v42 }
 0x578   :  { %3278 = vmatpush3.bf16.msra.mxu1 %v3733_v47 }
 0x579   :  { %3279 = vmatprep.subr.bf16.mxu1 %v3734_v49 }
 0x57c   :  { %3280 = vmatpush3.bf16.msra.mxu1 %v3735_v51  ;;  %v3764_v51 = vld [vmem:[#allocation2 + $0xc20] ss:$8 sps:$4 sm:$0xff]  }
 0x57d   :  { %3281 = vmatprep.subr.bf16.mxu1 %v3736_v52 }
 0x580   :  { %3282 = vmatpush3.bf16.msra.mxu1 %v3737_v56 }
 0x581   :  { %3283 = vmatprep.subr.bf16.mxu1 %v3738_v58 }
 0x584   :  { %3284 = vmatpush3.bf16.msra.mxu1 %v3739_v57 }
 0x585   :  { %3285 = vmatprep.subr.bf16.mxu1 %v3740_v61 }
 0x588   :  { %3286 = vmatpush3.bf16.msra.mxu1 %v3741_v2 }
 0x589   :  { %3293 = vmatprep.subr.bf16.mxu1 %v3742_v4 }
 0x58b   :  { %2712 = vmatmul.mubr.bf16.vlgmr.msra.gmra.mrb[24].mxu1 %v1935_v12 }
 0x58c   :  { %3294 = vmatpush3.bf16.msra.mxu1 %v3743_v55  ;;  %2751 = vmatprep.mubr.bf16.mxu1 %v1938_v13 }
 0x58d   :  { %3295 = vmatprep.subr.bf16.mxu1 %v3744_v3 }
 0x590   :  { %3296 = vmatpush3.bf16.msra.mxu1 %v3745_v14 }
 0x591   :  { %3297 = vmatprep.subr.bf16.mxu1 %v3746_v15 }
 0x594   :  { %3298 = vmatpush3.bf16.msra.mxu1 %v3747_v60 }
 0x595   :  { %3299 = vmatprep.subr.bf16.mxu1 %v3748_v17  ;;  %v2779_v17 = vrot.slane %v4047_v63, %v292_v10 }
 0x598   :  { %3300 = vmatpush3.bf16.msra.mxu1 %v3749_v19 }
 0x599   :  { %3301 = vmatprep.subr.bf16.mxu1 %v3750_v62 }
 0x59c   :  { %3302 = vmatpush3.bf16.msra.mxu1 %v3751_v50 }
 0x59d   :  { %3303 = vmatprep.subr.bf16.mxu1 %v3752_v16 }
 0x5a0   :  { %3304 = vmatpush3.bf16.msra.mxu1 %v3753_v44 }
 0x5a1   :  { %3305 = vmatprep.subr.bf16.mxu1 %v3754_v30 }
 0x5a4   :  { %3306 = vmatpush3.bf16.msra.mxu1 %v3755_v21 }
 0x5a5   :  { %3307 = vmatprep.subr.bf16.mxu1 %v3756_v22 }
 0x5a8   :  { %3308 = vmatpush3.bf16.msra.mxu1 %v3757_v23 }
 0x5a9   :  { %3364 = vmatprep.subr.bf16.mxu1 %v3848_v0 }
 0x5ab   :  { %2752 = vmatmul.mubr.bf16.vlgmr.msra.gmra.mrb[28].mxu1 %v1937_v26 }
 0x5ac   :  { %3380 = vmatprep.mubr.msk.bf16.mxu1 %vm3849_vm0, %v3848_v0  ;;  %3365 = vmatpush3.bf16.msra.mxu1 %v3758_v31 }
 0x5ad   :  { %3366 = vmatprep.subr.bf16.mxu1 %v3848_v0 }
 0x5b0   :  { %3367 = vmatpush3.bf16.msra.mxu1 %v3759_v33 }
 0x5b1   :  { %3368 = vmatprep.subr.bf16.mxu1 %v3848_v0 }
 0x5b4   :  { %3369 = vmatpush3.bf16.msra.mxu1 %v3760_v34 }
 0x5b5   :  { %3370 = vmatprep.subr.bf16.mxu1 %v3848_v0 }
 0x5b8   :  { %3371 = vmatpush3.bf16.msra.mxu1 %v3761_v35 }
 0x5b9   :  { %3372 = vmatprep.subr.bf16.mxu1 %v3848_v0 }
 0x5bc   :  { %3373 = vmatpush3.bf16.msra.mxu1 %v3762_v36 }
 0x5bd   :  { %3374 = vmatprep.subr.bf16.mxu1 %v3848_v0 }
 0x5c0   :  { %3375 = vmatpush3.bf16.msra.mxu1 %v3763_v37 }
 0x5c1   :  { %3376 = vmatprep.subr.bf16.mxu1 %v3848_v0 }
 0x5c4   :  { %3377 = vmatpush3.bf16.msra.mxu1 %v3764_v51 }
 0x5c5   :  { %3378 = vmatprep.subr.bf16.mxu1 %v3848_v0 }
 0x5c8   :  { %3379 = vmatpush3.bf16.msra.mxu1 %v3765_v18 }
 0x5de   :  { %v3199_v11 = vpop.f32.mrb[8].mxu1 }
 0x5df   :  { %v3200_v27 = vpop.f32.mrb[9].mxu1 }
 0x5e0   :  { %v3201_v29 = vadd.f32 %v3200_v27, %v3199_v11  ;;  %v3202_v24 = vpop.f32.mrb[10].mxu1 }
 0x5e1   :  { %v3203_v28 = vpop.f32.mrb[11].mxu1 }
 0x5e2   :  { %v2554_v40 = vadd.f32 %v3201_v29, %v1942_v38 }
 0x5fe   :  { %v3221_v39 = vpop.f32.mrb[12].mxu1 }
 0x5ff   :  { %v3222_v5 = vpop.f32.mrb[13].mxu1 }
 0x600   :  { %v3223_v41 = vadd.f32 %v3222_v5, %v3221_v39  ;;  %v3224_v42 = vpop.f32.mrb[14].mxu1 }
 0x601   :  { %v3225_v47 = vpop.f32.mrb[15].mxu1 }
 0x602   :  { %v2594_v49 = vadd.f32 %v3223_v41, %v2554_v40 }
 0x61e   :  { %v3243_v52 = vpop.f32.mrb[16].mxu1 }
 0x61f   :  { %v3244_v46 = vpop.f32.mrb[17].mxu1 }
 0x620   :  { %v3245_v53 = vadd.f32 %v3244_v46, %v3243_v52  ;;  %v3246_v54 = vpop.f32.mrb[18].mxu1 }
 0x621   :  { %v3247_v56 = vpop.f32.mrb[19].mxu1 }
 0x622   :  { %v2634_v58 = vadd.f32 %v3245_v53, %v2594_v49 }
 0x63e   :  { %v3265_v8 = vpop.f32.mrb[20].mxu1 }
 0x63f   :  { %v3266_v48 = vpop.f32.mrb[21].mxu1 }
 0x640   :  { %v3267_v59 = vadd.f32 %v3266_v48, %v3265_v8  ;;  %v3268_v57 = vpop.f32.mrb[22].mxu1 }
 0x641   :  { %v3269_v61 = vpop.f32.mrb[23].mxu1 }
 0x642   :  { %v2674_v1 = vadd.f32 %v3267_v59, %v2634_v58 }
 0x65e   :  { %v3287_v7 = vpop.f32.mrb[24].mxu1 }
 0x65f   :  { %v3288_v2 = vpop.f32.mrb[25].mxu1 }
 0x660   :  { %v3289_v4 = vadd.f32 %v3288_v2, %v3287_v7  ;;  %v3290_v6 = vpop.f32.mrb[26].mxu1 }
 0x661   :  { %v3291_v9 = vpop.f32.mrb[27].mxu1 }
 0x662   :  { %v2714_v55 = vadd.f32 %v3289_v4, %v2674_v1 }
 0x67e   :  { %v3309_v0 = vpop.f32.mrb[28].mxu1 }
 0x67f   :  { %v3310_v12 = vpop.f32.mrb[29].mxu1 }
 0x680   :  { %v3311_v3 = vadd.f32 %v3310_v12, %v3309_v0  ;;  %v3312_v13 = vpop.f32.mrb[30].mxu1 }
 0x681   :  { %v3313_v14 = vpop.f32.mrb[31].mxu1 }
 0x682   :  { %v2754_v15 = vadd.f32 %v3311_v3, %v2714_v55 }
 0x684   :  { %v2775_v60 = vpack.c.bf16 %v2754_v15, %v2754_v15 }
 0x686   :  { %3381 = vmatmul.mubr.bf16.vlgmr.msra.gmra.mrb[32].mxu1 %v2775_v60 }
 0x759   :  { %v2862_v19 = vpop.f32.mrb[32].mxu1 }
 0x75a   :  { %v2863_v62 = vadd.f32 %v2862_v19, %v2779_v17  ;;  %v3382_v50 = vpop.f32.mrb[33].mxu1 }
 0x75b   :  { %v2865_v16 = vpop.f32.mrb[34].mxu1 }
 0x75c   :  { %v3164_v44 = vmul.f32 -1.442695, %v2863_v62  ;;  %v3383_v20 = vpop.f32.mrb[35].mxu1 }
 0x75e   :  { %3766 = vpow2.f32 %v3164_v44 }
 0x768   :  { %v3767_v30 = vpop.eup %3766 }
 0x769   :  { %v2871_v45 = vadd.f32 1.0, %v3767_v30 }
 0x76b   :  { %3768 = vrcp.f32 %v2871_v45 }
 0x775   :  { %v3769_v21 = vpop.eup %3768 }
 0x776   :  { %2874 = vst [vmem:[#allocation7] sm:$0x3] %v3769_v21 }
 0x777   :  { %3825 = shalt.err (!%p3822_p6)
}
 0x778   :  { %s3826_s20 = scalar_lea.hbm %s4152_s3, 32 }
 0x779   :  { %p3827_p7 = scmp.ne.s32.totalorder %s4152_s3, %s3826_s20  ;;  %p3830_p8 = scmp.lt.u32.totalorder %s3826_s20, %s4152_s3 }
 0x77b   :  { %p3832_p9 = pnand %p3830_p8, %p3827_p7 }
 0x77d   :  { %3835 = shalt.err (!%p3832_p9)
}
 0x77e   :  { %2884 = dma.vmem_to_hbm [thread:$0]  %s2882_s16, 32, %s4152_s3, [#allocation4]  }
 0x77f   :  { %3840 = dma.done.wait [#allocation4], 32  }
 0x780   :  { %3841 = vsyncadd [#allocation4], 4294967264 }
 0x781   :  { %2888 = vsyncpa [#allocation3], 1 }
 0x782   :  { %2889 = vsyncpa [#allocation6], 1 }
 0x783   :  { %2890 = vsyncpa [#allocation4], 1 }

</bundles_post_ra>
